<compile_context>
chip_gen: v7x
topology: tpu7x:2x2x1
jax: 0.10.0
libtpu: 0.0.40
codegen_flags: <defaults>
</compile_context>

<pallas_src>
import math

import jax
import jax.numpy as jnp
from jax.experimental import pallas as pl
from jax.experimental.pallas import tpu as pltpu

# ---- model hyper-parameters (small, consistent with the module) -------------
BATCH = 2
SEQ = 8
EMBED = 32
HEADS = 8
DH = EMBED // HEADS          # single_head_dim = 4
EXP = 4
HID = EXP * EMBED            # feed-forward hidden = 128
EPS = 1e-5                   # nn.LayerNorm default
NEG = -1e20                  # masked_fill value (matches PyTorch source)


# ------------------------------ Pallas kernel --------------------------------
def decoder_block_kernel(x_ref, key_ref, value_ref, bias_ref,
                         wslab_ref, vslab_ref, out_ref):
    BS = x_ref.shape[0]      # folded batch*seq rows
    E = EMBED

    x = x_ref[...]           # (BS, E)   query for self-attention
    k_in = key_ref[...]      # (BS, E)
    v_in = value_ref[...]    # (BS, E)

    # additive attention-bias slab: [:, :BS] self-attn (causal + block-diag),
    #                               [:, BS:] cross-attn (block-diag over batch)
    self_bias = bias_ref[:, :BS]
    cross_bias = bias_ref[:, BS:]

    # ---- packed weight slab (E, 512), static column slices --------------------
    w_qkv1 = wslab_ref[:, 0:3 * E]            # [Wq1_big*scale | Wk1_big | Wv1_big]
    wo1 = wslab_ref[:, 3 * E:4 * E]
    wq2 = wslab_ref[:, 4 * E:5 * E]           # already scaled by 1/sqrt(DH)
    wk2 = wslab_ref[:, 5 * E:6 * E]
    wv2 = wslab_ref[:, 6 * E:7 * E]
    wo2 = wslab_ref[:, 7 * E:8 * E]
    wf1 = wslab_ref[:, 8 * E:8 * E + HID]     # (E, HID)
    wf2t = wslab_ref[:, 8 * E + HID:8 * E + 2 * HID]   # (E, HID) == wf2.T

    # ---- packed vector slab (10, 128) ----------------------------------------
    bo1 = vslab_ref[0:1, :E]
    g0 = vslab_ref[1:2, :E]
    b0 = vslab_ref[2:3, :E]
    bo2 = vslab_ref[3:4, :E]
    g1 = vslab_ref[4:5, :E]
    b1 = vslab_ref[5:6, :E]
    g2 = vslab_ref[6:7, :E]
    b2 = vslab_ref[7:8, :E]
    bf1 = vslab_ref[8:9, :]                   # (1, HID)
    bf2 = vslab_ref[9:10, :E]

    def layernorm(t, g, b):
        mu = jnp.mean(t, axis=-1, keepdims=True)
        var = jnp.mean((t - mu) ** 2, axis=-1, keepdims=True)
        return (t - mu) * jax.lax.rsqrt(var + EPS) * g + b

    def attention(q_all, k_all, v_all, wo, bo, bias):
        """Multi-head attention; projections already applied, scale folded into Q."""
        ctxs = []
        for h in range(HEADS):                # static unroll, H = 8
            sl = slice(h * DH, (h + 1) * DH)
            qh = q_all[:, sl]
            kh = k_all[:, sl]
            vh = v_all[:, sl]
            prod = jnp.dot(qh, kh.T, preferred_element_type=jnp.float32) + bias
            e = jnp.exp(prod)                 # masked entries: exp(-1e20) == 0 exactly
            denom = jnp.sum(e, axis=-1, keepdims=True)
            sm = e / denom                    # softmax(dim=-1), exact divide
            ctxs.append(jnp.dot(sm, vh, preferred_element_type=jnp.float32))
        ctx = jnp.concatenate(ctxs, axis=1)   # (BS, E), heads along lanes (registers)
        # concat over heads + output Linear == single dot against Wo
        return jnp.dot(ctx, wo, preferred_element_type=jnp.float32) + bo

    # ---- DecoderBlock: self-attention + residual + LayerNorm (dropout = id) ---
    qkv1 = jnp.dot(x, w_qkv1, preferred_element_type=jnp.float32)   # (BS, 3E)
    attn1 = attention(qkv1[:, 0:E], qkv1[:, E:2 * E], qkv1[:, 2 * E:3 * E],
                      wo1, bo1, self_bias)
    xq = layernorm(attn1 + x, g0, b0)

    # ---- TransformerBlock(key, query=xq, value) --------------------------------
    q2 = jnp.dot(xq, wq2, preferred_element_type=jnp.float32)
    k2 = jnp.dot(k_in, wk2, preferred_element_type=jnp.float32)
    v2 = jnp.dot(v_in, wv2, preferred_element_type=jnp.float32)
    attn2 = attention(q2, k2, v2, wo2, bo2, cross_bias)
    # NOTE: original PyTorch normalizes attention_out only (no +query residual).
    n1 = layernorm(attn2, g1, b1)                                    # dropout1 -> id

    hdn = jnp.maximum(jnp.dot(n1, wf1, preferred_element_type=jnp.float32) + bf1, 0.0)
    ff = jax.lax.dot_general(hdn, wf2t,
                             dimension_numbers=(((1,), (1,)), ((), ())),
                             preferred_element_type=jnp.float32) + bf2
    out = layernorm(ff + n1, g2, b2)                                 # dropout2 -> id

    out_ref[...] = out.astype(out_ref.dtype)


# ------------------------ one-time parameter preparation ----------------------
def prepare_decoder_block(params, mask, batch, seq):
    """Builds the packed weight slab, vector slab and additive bias slab ONCE."""
    scale = 1.0 / math.sqrt(DH)
    eye_h = jnp.eye(HEADS, dtype=jnp.float32)
    kron = lambda w: jnp.kron(eye_h, w)       # per-head (DH,DH) -> block-diag (E,E)

    # One lane-dense weight slab (E, 512 = 4*128); 1/sqrt(DH) folded into Q weights,
    # wf2 packed transposed so ALL matrices live in a single slab.
    w_slab = jnp.concatenate(
        [kron(params["wq1"] * scale), kron(params["wk1"]), kron(params["wv1"]),
         params["wo1"],
         kron(params["wq2"] * scale), kron(params["wk2"]), kron(params["wv2"]),
         params["wo2"],
         params["wf1"],
         params["wf2"].T],
        axis=1)                                                    # (32, 512)

    # One (10, 128) slab for all bias / LayerNorm vectors.
    def row128(v):
        v = v.reshape(-1)
        return jnp.pad(v, (0, 128 - v.shape[0]))
    v_slab = jnp.stack([
        row128(params["bo1"]), row128(params["g0"]), row128(params["b0"]),
        row128(params["bo2"]), row128(params["g1"]), row128(params["b1"]),
        row128(params["g2"]), row128(params["b2"]),
        row128(params["bf1"]), row128(params["bf2"]),
    ])                                                             # (10, 128)

    # Batch-folded additive bias (0 where attending is allowed, -1e20 otherwise):
    # block-diagonal so the two batches never attend to each other.
    eye_b = jnp.eye(batch, dtype=jnp.float32)
    self_keep = jnp.kron(eye_b, mask.astype(jnp.float32))          # (BS, BS)
    cross_keep = jnp.kron(eye_b, jnp.ones((seq, seq), jnp.float32))  # (BS, BS)
    keep = jnp.concatenate([self_keep, cross_keep], axis=1)        # (BS, 2*BS)
    bias = jnp.where(keep == 0.0, jnp.float32(NEG), jnp.float32(0.0))

    return {"w_slab": w_slab, "v_slab": v_slab, "bias": bias}


# ------------------------------ jitted launcher -------------------------------
@jax.jit
def decoder_block(x, key, value, prep):
    B, S, E = x.shape
    BS = B * S

    x2 = x.reshape(BS, E)
    k2 = key.reshape(BS, E)
    v2 = value.reshape(BS, E)

    # Single invocation (no grid): whole arrays live in VMEM, no double-buffering.
    vmem = pl.BlockSpec(memory_space=pltpu.MemorySpace.VMEM)

    out2 = pl.pallas_call(
        decoder_block_kernel,
        out_shape=jax.ShapeDtypeStruct((BS, E), x.dtype),
        in_specs=[vmem] * 6,
        out_specs=vmem,
    )(x2, k2, v2, prep["bias"], prep["w_slab"], prep["v_slab"])

    return out2.reshape(B, S, E)


# ------------------------------ pure-JAX reference ----------------------------
def _mha_ref(kk, qq, vv, wq, wk, wv, wo, bo, mask):
    B, S, E = kk.shape
    Sq = qq.shape[1]
    k = kk.reshape(B, S, HEADS, DH) @ wk
    q = qq.reshape(B, Sq, HEADS, DH) @ wq
    v = vv.reshape(B, S, HEADS, DH) @ wv
    k = k.transpose(0, 2, 1, 3)
    q = q.transpose(0, 2, 1, 3)
    v = v.transpose(0, 2, 1, 3)
    prod = jnp.einsum("bhqd,bhkd->bhqk", q, k)
    if mask is not None:
        prod = jnp.where(mask == 0.0, NEG, prod)
    prod = prod / math.sqrt(DH)
    sm = jax.nn.softmax(prod, axis=-1)
    ctx = jnp.einsum("bhqk,bhkd->bhqd", sm, v)
    concat = ctx.transpose(0, 2, 1, 3).reshape(B, Sq, E)
    return concat @ wo + bo


def _ln_ref(t, g, b):
    mu = jnp.mean(t, axis=-1, keepdims=True)
    var = jnp.mean((t - mu) ** 2, axis=-1, keepdims=True)
    return (t - mu) / jnp.sqrt(var + EPS) * g + b


def decoder_block_ref(x, key, value, mask, p):
    attn = _mha_ref(x, x, x, p["wq1"], p["wk1"], p["wv1"], p["wo1"], p["bo1"], mask)
    xq = _ln_ref(attn + x, p["g0"], p["b0"])
    attn2 = _mha_ref(key, xq, value, p["wq2"], p["wk2"], p["wv2"], p["wo2"], p["bo2"], None)
    n1 = _ln_ref(attn2, p["g1"], p["b1"])
    h = jnp.maximum(n1 @ p["wf1"] + p["bf1"], 0.0)
    ff = h @ p["wf2"] + p["bf2"]
    return _ln_ref(ff + n1, p["g2"], p["b2"])


# ------------------------------ main ------------------------------------------
if __name__ == "__main__":
    root = jax.random.PRNGKey(0)
    keys = jax.random.split(root, 32)
    ki = iter(keys)

    def w(shape, scale):
        return jax.random.normal(next(ki), shape, jnp.float32) * scale

    params = {
        # self-attention (DecoderBlock.attention)
        "wq1": w((DH, DH), 1.0 / math.sqrt(DH)),
        "wk1": w((DH, DH), 1.0 / math.sqrt(DH)),
        "wv1": w((DH, DH), 1.0 / math.sqrt(DH)),
        "wo1": w((EMBED, EMBED), 1.0 / math.sqrt(EMBED)),
        "bo1": w((1, EMBED), 0.01),
        # DecoderBlock.norm
        "g0": jnp.ones((1, EMBED), jnp.float32),
        "b0": jnp.zeros((1, EMBED), jnp.float32),
        # cross-attention (TransformerBlock.attention)
        "wq2": w((DH, DH), 1.0 / math.sqrt(DH)),
        "wk2": w((DH, DH), 1.0 / math.sqrt(DH)),
        "wv2": w((DH, DH), 1.0 / math.sqrt(DH)),
        "wo2": w((EMBED, EMBED), 1.0 / math.sqrt(EMBED)),
        "bo2": w((1, EMBED), 0.01),
        # norm1 / norm2
        "g1": jnp.ones((1, EMBED), jnp.float32),
        "b1": jnp.zeros((1, EMBED), jnp.float32),
        "g2": jnp.ones((1, EMBED), jnp.float32),
        "b2": jnp.zeros((1, EMBED), jnp.float32),
        # feed forward
        "wf1": w((EMBED, HID), 1.0 / math.sqrt(EMBED)),
        "bf1": w((1, HID), 0.01),
        "wf2": w((HID, EMBED), 1.0 / math.sqrt(HID)),
        "bf2": w((1, EMBED), 0.01),
    }

    x = jax.random.normal(next(ki), (BATCH, SEQ, EMBED), jnp.float32)
    key_in = jax.random.normal(next(ki), (BATCH, SEQ, EMBED), jnp.float32)
    value_in = jax.random.normal(next(ki), (BATCH, SEQ, EMBED), jnp.float32)
    # causal mask (S, S), broadcast over batch & heads (mask == 0 -> -1e20)
    mask = jnp.tril(jnp.ones((SEQ, SEQ), jnp.float32))

    # One-time constant preparation (NOT on the per-call launch path).
    prep = jax.block_until_ready(prepare_decoder_block(params, mask, BATCH, SEQ))

    out = decoder_block(x, key_in, value_in, prep)
    out = jax.block_until_ready(out)

    ref = jax.block_until_ready(decoder_block_ref(x, key_in, value_in, mask, params))
    assert out.shape == (BATCH, SEQ, EMBED)
    assert jnp.allclose(out, ref, atol=1e-2, rtol=1e-2), (
        float(jnp.max(jnp.abs(out - ref)))
    )

    print("KERNEL_OK")
</pallas_src>

<mosaic_0001>
module attributes {stable_mosaic.version = 11 : i64} {
  func.func @decoder_block_kernel(%arg0: memref<16x32xf32, #tpu.memory_space<vmem>>, %arg1: memref<16x32xf32, #tpu.memory_space<vmem>>, %arg2: memref<16x32xf32, #tpu.memory_space<vmem>>, %arg3: memref<16x32xf32, #tpu.memory_space<vmem>>, %arg4: memref<32x512xf32, #tpu.memory_space<vmem>>, %arg5: memref<10x128xf32, #tpu.memory_space<vmem>>, %arg6: memref<16x32xf32, #tpu.memory_space<vmem>>) attributes {dimension_semantics = [], scalar_prefetch = 0 : i64, scratch_operands = 0 : i64, tpu.core_type = #tpu.core_type<tc>} {
    %c0 = arith.constant 0 : index
    %c0_0 = arith.constant 0 : index
    %0 = vector.load %arg0[%c0, %c0_0] : memref<16x32xf32, #tpu.memory_space<vmem>>, vector<16x32xf32>
    %c0_1 = arith.constant 0 : index
    %c0_2 = arith.constant 0 : index
    %1 = vector.load %arg1[%c0_1, %c0_2] : memref<16x32xf32, #tpu.memory_space<vmem>>, vector<16x32xf32>
    %c0_3 = arith.constant 0 : index
    %c0_4 = arith.constant 0 : index
    %2 = vector.load %arg2[%c0_3, %c0_4] : memref<16x32xf32, #tpu.memory_space<vmem>>, vector<16x32xf32>
    %c0_5 = arith.constant 0 : index
    %c0_6 = arith.constant 0 : index
    %3 = vector.load %arg3[%c0_5, %c0_6] : memref<16x32xf32, #tpu.memory_space<vmem>>, vector<16x16xf32>
    %c0_7 = arith.constant 0 : index
    %c16 = arith.constant 16 : index
    %4 = vector.load %arg3[%c0_7, %c16] : memref<16x32xf32, #tpu.memory_space<vmem>>, vector<16x16xf32>
    %c0_8 = arith.constant 0 : index
    %c0_9 = arith.constant 0 : index
    %5 = vector.load %arg4[%c0_8, %c0_9] : memref<32x512xf32, #tpu.memory_space<vmem>>, vector<32x96xf32>
    %c0_10 = arith.constant 0 : index
    %c96 = arith.constant 96 : index
    %6 = vector.load %arg4[%c0_10, %c96] : memref<32x512xf32, #tpu.memory_space<vmem>>, vector<32x32xf32>
    %c0_11 = arith.constant 0 : index
    %c128 = arith.constant 128 : index
    %7 = vector.load %arg4[%c0_11, %c128] : memref<32x512xf32, #tpu.memory_space<vmem>>, vector<32x32xf32>
    %c0_12 = arith.constant 0 : index
    %c160 = arith.constant 160 : index
    %8 = vector.load %arg4[%c0_12, %c160] : memref<32x512xf32, #tpu.memory_space<vmem>>, vector<32x32xf32>
    %c0_13 = arith.constant 0 : index
    %c192 = arith.constant 192 : index
    %9 = vector.load %arg4[%c0_13, %c192] : memref<32x512xf32, #tpu.memory_space<vmem>>, vector<32x32xf32>
    %c0_14 = arith.constant 0 : index
    %c224 = arith.constant 224 : index
    %10 = vector.load %arg4[%c0_14, %c224] : memref<32x512xf32, #tpu.memory_space<vmem>>, vector<32x32xf32>
    %c0_15 = arith.constant 0 : index
    %c256 = arith.constant 256 : index
    %11 = vector.load %arg4[%c0_15, %c256] : memref<32x512xf32, #tpu.memory_space<vmem>>, vector<32x128xf32>
    %c0_16 = arith.constant 0 : index
    %c384 = arith.constant 384 : index
    %12 = vector.load %arg4[%c0_16, %c384] : memref<32x512xf32, #tpu.memory_space<vmem>>, vector<32x128xf32>
    %c0_17 = arith.constant 0 : index
    %c0_18 = arith.constant 0 : index
    %13 = vector.load %arg5[%c0_17, %c0_18] : memref<10x128xf32, #tpu.memory_space<vmem>>, vector<1x32xf32>
    %c1 = arith.constant 1 : index
    %c0_19 = arith.constant 0 : index
    %14 = vector.load %arg5[%c1, %c0_19] : memref<10x128xf32, #tpu.memory_space<vmem>>, vector<1x32xf32>
    %c2 = arith.constant 2 : index
    %c0_20 = arith.constant 0 : index
    %15 = vector.load %arg5[%c2, %c0_20] : memref<10x128xf32, #tpu.memory_space<vmem>>, vector<1x32xf32>
    %c3 = arith.constant 3 : index
    %c0_21 = arith.constant 0 : index
    %16 = vector.load %arg5[%c3, %c0_21] : memref<10x128xf32, #tpu.memory_space<vmem>>, vector<1x32xf32>
    %c4 = arith.constant 4 : index
    %c0_22 = arith.constant 0 : index
    %17 = vector.load %arg5[%c4, %c0_22] : memref<10x128xf32, #tpu.memory_space<vmem>>, vector<1x32xf32>
    %c5 = arith.constant 5 : index
    %c0_23 = arith.constant 0 : index
    %18 = vector.load %arg5[%c5, %c0_23] : memref<10x128xf32, #tpu.memory_space<vmem>>, vector<1x32xf32>
    %c6 = arith.constant 6 : index
    %c0_24 = arith.constant 0 : index
    %19 = vector.load %arg5[%c6, %c0_24] : memref<10x128xf32, #tpu.memory_space<vmem>>, vector<1x32xf32>
    %c7 = arith.constant 7 : index
    %c0_25 = arith.constant 0 : index
    %20 = vector.load %arg5[%c7, %c0_25] : memref<10x128xf32, #tpu.memory_space<vmem>>, vector<1x32xf32>
    %c8 = arith.constant 8 : index
    %c0_26 = arith.constant 0 : index
    %21 = vector.load %arg5[%c8, %c0_26] : memref<10x128xf32, #tpu.memory_space<vmem>>, vector<1x128xf32>
    %c9 = arith.constant 9 : index
    %c0_27 = arith.constant 0 : index
    %22 = vector.load %arg5[%c9, %c0_27] : memref<10x128xf32, #tpu.memory_space<vmem>>, vector<1x32xf32>
    %cst = arith.constant dense<0.000000e+00> : vector<16x96xf32>
    %23 = tpu.matmul %0, %5, %cst {dimension_numbers = #tpu.dot_dimension_numbers<[1], [0], [0], [1], [0, 0, 1, 1], [], []>} : vector<16x32xf32>, vector<32x96xf32>, vector<16x96xf32> -> vector<16x96xf32>
    %24 = vector.extract_strided_slice %23 {offsets = [0, 0], sizes = [16, 32], strides = [1, 1]} : vector<16x96xf32> to vector<16x32xf32>
    %25 = vector.extract_strided_slice %23 {offsets = [0, 32], sizes = [16, 32], strides = [1, 1]} : vector<16x96xf32> to vector<16x32xf32>
    %26 = vector.extract_strided_slice %23 {offsets = [0, 64], sizes = [16, 32], strides = [1, 1]} : vector<16x96xf32> to vector<16x32xf32>
    %27 = vector.extract_strided_slice %24 {offsets = [0, 0], sizes = [16, 4], strides = [1, 1]} : vector<16x32xf32> to vector<16x4xf32>
    %28 = vector.extract_strided_slice %25 {offsets = [0, 0], sizes = [16, 4], strides = [1, 1]} : vector<16x32xf32> to vector<16x4xf32>
    %29 = vector.extract_strided_slice %26 {offsets = [0, 0], sizes = [16, 4], strides = [1, 1]} : vector<16x32xf32> to vector<16x4xf32>
    %30 = tpu.transpose %28, [1, 0] : vector<16x4xf32> -> vector<4x16xf32>
    %cst_28 = arith.constant dense<0.000000e+00> : vector<16x16xf32>
    %31 = tpu.matmul %27, %30, %cst_28 {dimension_numbers = #tpu.dot_dimension_numbers<[1], [0], [0], [1], [0, 0, 1, 1], [], []>} : vector<16x4xf32>, vector<4x16xf32>, vector<16x16xf32> -> vector<16x16xf32>
    %32 = arith.addf %31, %3 : vector<16x16xf32>
    %33 = math.exp %32 : vector<16x16xf32>
    %cst_29 = arith.constant dense<0.000000e+00> : vector<16xf32>
    %34 = vector.multi_reduction <add>, %33, %cst_29 [1] : vector<16x16xf32> to vector<16xf32>
    %35 = vector.shape_cast %34 : vector<16xf32> to vector<16x1xf32>
    %36 = vector.broadcast %35 : vector<16x1xf32> to vector<16x16xf32>
    %37 = arith.divf %33, %36 : vector<16x16xf32>
    %cst_30 = arith.constant dense<0.000000e+00> : vector<16x4xf32>
    %38 = tpu.matmul %37, %29, %cst_30 {dimension_numbers = #tpu.dot_dimension_numbers<[1], [0], [0], [1], [0, 0, 1, 1], [], []>} : vector<16x16xf32>, vector<16x4xf32>, vector<16x4xf32> -> vector<16x4xf32>
    %39 = vector.extract_strided_slice %24 {offsets = [0, 4], sizes = [16, 4], strides = [1, 1]} : vector<16x32xf32> to vector<16x4xf32>
    %40 = vector.extract_strided_slice %25 {offsets = [0, 4], sizes = [16, 4], strides = [1, 1]} : vector<16x32xf32> to vector<16x4xf32>
    %41 = vector.extract_strided_slice %26 {offsets = [0, 4], sizes = [16, 4], strides = [1, 1]} : vector<16x32xf32> to vector<16x4xf32>
    %42 = tpu.transpose %40, [1, 0] : vector<16x4xf32> -> vector<4x16xf32>
    %cst_31 = arith.constant dense<0.000000e+00> : vector<16x16xf32>
    %43 = tpu.matmul %39, %42, %cst_31 {dimension_numbers = #tpu.dot_dimension_numbers<[1], [0], [0], [1], [0, 0, 1, 1], [], []>} : vector<16x4xf32>, vector<4x16xf32>, vector<16x16xf32> -> vector<16x16xf32>
    %44 = arith.addf %43, %3 : vector<16x16xf32>
    %45 = math.exp %44 : vector<16x16xf32>
    %cst_32 = arith.constant dense<0.000000e+00> : vector<16xf32>
    %46 = vector.multi_reduction <add>, %45, %cst_32 [1] : vector<16x16xf32> to vector<16xf32>
    %47 = vector.shape_cast %46 : vector<16xf32> to vector<16x1xf32>
    %48 = vector.broadcast %47 : vector<16x1xf32> to vector<16x16xf32>
    %49 = arith.divf %45, %48 : vector<16x16xf32>
    %cst_33 = arith.constant dense<0.000000e+00> : vector<16x4xf32>
    %50 = tpu.matmul %49, %41, %cst_33 {dimension_numbers = #tpu.dot_dimension_numbers<[1], [0], [0], [1], [0, 0, 1, 1], [], []>} : vector<16x16xf32>, vector<16x4xf32>, vector<16x4xf32> -> vector<16x4xf32>
    %51 = vector.extract_strided_slice %24 {offsets = [0, 8], sizes = [16, 4], strides = [1, 1]} : vector<16x32xf32> to vector<16x4xf32>
    %52 = vector.extract_strided_slice %25 {offsets = [0, 8], sizes = [16, 4], strides = [1, 1]} : vector<16x32xf32> to vector<16x4xf32>
    %53 = vector.extract_strided_slice %26 {offsets = [0, 8], sizes = [16, 4], strides = [1, 1]} : vector<16x32xf32> to vector<16x4xf32>
    %54 = tpu.transpose %52, [1, 0] : vector<16x4xf32> -> vector<4x16xf32>
    %cst_34 = arith.constant dense<0.000000e+00> : vector<16x16xf32>
    %55 = tpu.matmul %51, %54, %cst_34 {dimension_numbers = #tpu.dot_dimension_numbers<[1], [0], [0], [1], [0, 0, 1, 1], [], []>} : vector<16x4xf32>, vector<4x16xf32>, vector<16x16xf32> -> vector<16x16xf32>
    %56 = arith.addf %55, %3 : vector<16x16xf32>
    %57 = math.exp %56 : vector<16x16xf32>
    %cst_35 = arith.constant dense<0.000000e+00> : vector<16xf32>
    %58 = vector.multi_reduction <add>, %57, %cst_35 [1] : vector<16x16xf32> to vector<16xf32>
    %59 = vector.shape_cast %58 : vector<16xf32> to vector<16x1xf32>
    %60 = vector.broadcast %59 : vector<16x1xf32> to vector<16x16xf32>
    %61 = arith.divf %57, %60 : vector<16x16xf32>
    %cst_36 = arith.constant dense<0.000000e+00> : vector<16x4xf32>
    %62 = tpu.matmul %61, %53, %cst_36 {dimension_numbers = #tpu.dot_dimension_numbers<[1], [0], [0], [1], [0, 0, 1, 1], [], []>} : vector<16x16xf32>, vector<16x4xf32>, vector<16x4xf32> -> vector<16x4xf32>
    %63 = vector.extract_strided_slice %24 {offsets = [0, 12], sizes = [16, 4], strides = [1, 1]} : vector<16x32xf32> to vector<16x4xf32>
    %64 = vector.extract_strided_slice %25 {offsets = [0, 12], sizes = [16, 4], strides = [1, 1]} : vector<16x32xf32> to vector<16x4xf32>
    %65 = vector.extract_strided_slice %26 {offsets = [0, 12], sizes = [16, 4], strides = [1, 1]} : vector<16x32xf32> to vector<16x4xf32>
    %66 = tpu.transpose %64, [1, 0] : vector<16x4xf32> -> vector<4x16xf32>
    %cst_37 = arith.constant dense<0.000000e+00> : vector<16x16xf32>
    %67 = tpu.matmul %63, %66, %cst_37 {dimension_numbers = #tpu.dot_dimension_numbers<[1], [0], [0], [1], [0, 0, 1, 1], [], []>} : vector<16x4xf32>, vector<4x16xf32>, vector<16x16xf32> -> vector<16x16xf32>
    %68 = arith.addf %67, %3 : vector<16x16xf32>
    %69 = math.exp %68 : vector<16x16xf32>
    %cst_38 = arith.constant dense<0.000000e+00> : vector<16xf32>
    %70 = vector.multi_reduction <add>, %69, %cst_38 [1] : vector<16x16xf32> to vector<16xf32>
    %71 = vector.shape_cast %70 : vector<16xf32> to vector<16x1xf32>
    %72 = vector.broadcast %71 : vector<16x1xf32> to vector<16x16xf32>
    %73 = arith.divf %69, %72 : vector<16x16xf32>
    %cst_39 = arith.constant dense<0.000000e+00> : vector<16x4xf32>
    %74 = tpu.matmul %73, %65, %cst_39 {dimension_numbers = #tpu.dot_dimension_numbers<[1], [0], [0], [1], [0, 0, 1, 1], [], []>} : vector<16x16xf32>, vector<16x4xf32>, vector<16x4xf32> -> vector<16x4xf32>
    %75 = vector.extract_strided_slice %24 {offsets = [0, 16], sizes = [16, 4], strides = [1, 1]} : vector<16x32xf32> to vector<16x4xf32>
    %76 = vector.extract_strided_slice %25 {offsets = [0, 16], sizes = [16, 4], strides = [1, 1]} : vector<16x32xf32> to vector<16x4xf32>
    %77 = vector.extract_strided_slice %26 {offsets = [0, 16], sizes = [16, 4], strides = [1, 1]} : vector<16x32xf32> to vector<16x4xf32>
    %78 = tpu.transpose %76, [1, 0] : vector<16x4xf32> -> vector<4x16xf32>
    %cst_40 = arith.constant dense<0.000000e+00> : vector<16x16xf32>
    %79 = tpu.matmul %75, %78, %cst_40 {dimension_numbers = #tpu.dot_dimension_numbers<[1], [0], [0], [1], [0, 0, 1, 1], [], []>} : vector<16x4xf32>, vector<4x16xf32>, vector<16x16xf32> -> vector<16x16xf32>
    %80 = arith.addf %79, %3 : vector<16x16xf32>
    %81 = math.exp %80 : vector<16x16xf32>
    %cst_41 = arith.constant dense<0.000000e+00> : vector<16xf32>
    %82 = vector.multi_reduction <add>, %81, %cst_41 [1] : vector<16x16xf32> to vector<16xf32>
    %83 = vector.shape_cast %82 : vector<16xf32> to vector<16x1xf32>
    %84 = vector.broadcast %83 : vector<16x1xf32> to vector<16x16xf32>
    %85 = arith.divf %81, %84 : vector<16x16xf32>
    %cst_42 = arith.constant dense<0.000000e+00> : vector<16x4xf32>
    %86 = tpu.matmul %85, %77, %cst_42 {dimension_numbers = #tpu.dot_dimension_numbers<[1], [0], [0], [1], [0, 0, 1, 1], [], []>} : vector<16x16xf32>, vector<16x4xf32>, vector<16x4xf32> -> vector<16x4xf32>
    %87 = vector.extract_strided_slice %24 {offsets = [0, 20], sizes = [16, 4], strides = [1, 1]} : vector<16x32xf32> to vector<16x4xf32>
    %88 = vector.extract_strided_slice %25 {offsets = [0, 20], sizes = [16, 4], strides = [1, 1]} : vector<16x32xf32> to vector<16x4xf32>
    %89 = vector.extract_strided_slice %26 {offsets = [0, 20], sizes = [16, 4], strides = [1, 1]} : vector<16x32xf32> to vector<16x4xf32>
    %90 = tpu.transpose %88, [1, 0] : vector<16x4xf32> -> vector<4x16xf32>
    %cst_43 = arith.constant dense<0.000000e+00> : vector<16x16xf32>
    %91 = tpu.matmul %87, %90, %cst_43 {dimension_numbers = #tpu.dot_dimension_numbers<[1], [0], [0], [1], [0, 0, 1, 1], [], []>} : vector<16x4xf32>, vector<4x16xf32>, vector<16x16xf32> -> vector<16x16xf32>
    %92 = arith.addf %91, %3 : vector<16x16xf32>
    %93 = math.exp %92 : vector<16x16xf32>
    %cst_44 = arith.constant dense<0.000000e+00> : vector<16xf32>
    %94 = vector.multi_reduction <add>, %93, %cst_44 [1] : vector<16x16xf32> to vector<16xf32>
    %95 = vector.shape_cast %94 : vector<16xf32> to vector<16x1xf32>
    %96 = vector.broadcast %95 : vector<16x1xf32> to vector<16x16xf32>
    %97 = arith.divf %93, %96 : vector<16x16xf32>
    %cst_45 = arith.constant dense<0.000000e+00> : vector<16x4xf32>
    %98 = tpu.matmul %97, %89, %cst_45 {dimension_numbers = #tpu.dot_dimension_numbers<[1], [0], [0], [1], [0, 0, 1, 1], [], []>} : vector<16x16xf32>, vector<16x4xf32>, vector<16x4xf32> -> vector<16x4xf32>
    %99 = vector.extract_strided_slice %24 {offsets = [0, 24], sizes = [16, 4], strides = [1, 1]} : vector<16x32xf32> to vector<16x4xf32>
    %100 = vector.extract_strided_slice %25 {offsets = [0, 24], sizes = [16, 4], strides = [1, 1]} : vector<16x32xf32> to vector<16x4xf32>
    %101 = vector.extract_strided_slice %26 {offsets = [0, 24], sizes = [16, 4], strides = [1, 1]} : vector<16x32xf32> to vector<16x4xf32>
    %102 = tpu.transpose %100, [1, 0] : vector<16x4xf32> -> vector<4x16xf32>
    %cst_46 = arith.constant dense<0.000000e+00> : vector<16x16xf32>
    %103 = tpu.matmul %99, %102, %cst_46 {dimension_numbers = #tpu.dot_dimension_numbers<[1], [0], [0], [1], [0, 0, 1, 1], [], []>} : vector<16x4xf32>, vector<4x16xf32>, vector<16x16xf32> -> vector<16x16xf32>
    %104 = arith.addf %103, %3 : vector<16x16xf32>
    %105 = math.exp %104 : vector<16x16xf32>
    %cst_47 = arith.constant dense<0.000000e+00> : vector<16xf32>
    %106 = vector.multi_reduction <add>, %105, %cst_47 [1] : vector<16x16xf32> to vector<16xf32>
    %107 = vector.shape_cast %106 : vector<16xf32> to vector<16x1xf32>
    %108 = vector.broadcast %107 : vector<16x1xf32> to vector<16x16xf32>
    %109 = arith.divf %105, %108 : vector<16x16xf32>
    %cst_48 = arith.constant dense<0.000000e+00> : vector<16x4xf32>
    %110 = tpu.matmul %109, %101, %cst_48 {dimension_numbers = #tpu.dot_dimension_numbers<[1], [0], [0], [1], [0, 0, 1, 1], [], []>} : vector<16x16xf32>, vector<16x4xf32>, vector<16x4xf32> -> vector<16x4xf32>
    %111 = vector.extract_strided_slice %24 {offsets = [0, 28], sizes = [16, 4], strides = [1, 1]} : vector<16x32xf32> to vector<16x4xf32>
    %112 = vector.extract_strided_slice %25 {offsets = [0, 28], sizes = [16, 4], strides = [1, 1]} : vector<16x32xf32> to vector<16x4xf32>
    %113 = vector.extract_strided_slice %26 {offsets = [0, 28], sizes = [16, 4], strides = [1, 1]} : vector<16x32xf32> to vector<16x4xf32>
    %114 = tpu.transpose %112, [1, 0] : vector<16x4xf32> -> vector<4x16xf32>
    %cst_49 = arith.constant dense<0.000000e+00> : vector<16x16xf32>
    %115 = tpu.matmul %111, %114, %cst_49 {dimension_numbers = #tpu.dot_dimension_numbers<[1], [0], [0], [1], [0, 0, 1, 1], [], []>} : vector<16x4xf32>, vector<4x16xf32>, vector<16x16xf32> -> vector<16x16xf32>
    %116 = arith.addf %115, %3 : vector<16x16xf32>
    %117 = math.exp %116 : vector<16x16xf32>
    %cst_50 = arith.constant dense<0.000000e+00> : vector<16xf32>
    %118 = vector.multi_reduction <add>, %117, %cst_50 [1] : vector<16x16xf32> to vector<16xf32>
    %119 = vector.shape_cast %118 : vector<16xf32> to vector<16x1xf32>
    %120 = vector.broadcast %119 : vector<16x1xf32> to vector<16x16xf32>
    %121 = arith.divf %117, %120 : vector<16x16xf32>
    %cst_51 = arith.constant dense<0.000000e+00> : vector<16x4xf32>
    %122 = tpu.matmul %121, %113, %cst_51 {dimension_numbers = #tpu.dot_dimension_numbers<[1], [0], [0], [1], [0, 0, 1, 1], [], []>} : vector<16x16xf32>, vector<16x4xf32>, vector<16x4xf32> -> vector<16x4xf32>
    %123 = tpu.concatenate %38, %50, %62, %74, %86, %98, %110, %122 in 1 : vector<16x4xf32>, vector<16x4xf32>, vector<16x4xf32>, vector<16x4xf32>, vector<16x4xf32>, vector<16x4xf32>, vector<16x4xf32>, vector<16x4xf32> -> vector<16x32xf32>
    %cst_52 = arith.constant dense<0.000000e+00> : vector<16x32xf32>
    %124 = tpu.matmul %123, %6, %cst_52 {dimension_numbers = #tpu.dot_dimension_numbers<[1], [0], [0], [1], [0, 0, 1, 1], [], []>} : vector<16x32xf32>, vector<32x32xf32>, vector<16x32xf32> -> vector<16x32xf32>
    %125 = vector.broadcast %13 : vector<1x32xf32> to vector<16x32xf32>
    %126 = arith.addf %124, %125 : vector<16x32xf32>
    %127 = arith.addf %126, %0 : vector<16x32xf32>
    %cst_53 = arith.constant dense<0.000000e+00> : vector<16xf32>
    %128 = vector.multi_reduction <add>, %127, %cst_53 [1] : vector<16x32xf32> to vector<16xf32>
    %129 = vector.shape_cast %128 : vector<16xf32> to vector<16x1xf32>
    %cst_54 = arith.constant 3.200000e+01 : f32
    %130 = vector.broadcast %cst_54 : f32 to vector<16x1xf32>
    %131 = arith.divf %129, %130 : vector<16x1xf32>
    %132 = vector.broadcast %131 : vector<16x1xf32> to vector<16x32xf32>
    %133 = arith.subf %127, %132 : vector<16x32xf32>
    %134 = arith.mulf %133, %133 : vector<16x32xf32>
    %cst_55 = arith.constant dense<0.000000e+00> : vector<16xf32>
    %135 = vector.multi_reduction <add>, %134, %cst_55 [1] : vector<16x32xf32> to vector<16xf32>
    %136 = vector.shape_cast %135 : vector<16xf32> to vector<16x1xf32>
    %cst_56 = arith.constant 3.200000e+01 : f32
    %137 = vector.broadcast %cst_56 : f32 to vector<16x1xf32>
    %138 = arith.divf %136, %137 : vector<16x1xf32>
    %139 = vector.broadcast %131 : vector<16x1xf32> to vector<16x32xf32>
    %140 = arith.subf %127, %139 : vector<16x32xf32>
    %cst_57 = arith.constant 9.99999974E-6 : f32
    %141 = vector.broadcast %cst_57 : f32 to vector<16x1xf32>
    %142 = arith.addf %138, %141 : vector<16x1xf32>
    %143 = math.rsqrt %142 : vector<16x1xf32>
    %144 = vector.broadcast %143 : vector<16x1xf32> to vector<16x32xf32>
    %145 = arith.mulf %140, %144 : vector<16x32xf32>
    %146 = vector.broadcast %14 : vector<1x32xf32> to vector<16x32xf32>
    %147 = arith.mulf %145, %146 : vector<16x32xf32>
    %148 = vector.broadcast %15 : vector<1x32xf32> to vector<16x32xf32>
    %149 = arith.addf %147, %148 : vector<16x32xf32>
    %cst_58 = arith.constant dense<0.000000e+00> : vector<16x32xf32>
    %150 = tpu.matmul %149, %7, %cst_58 {dimension_numbers = #tpu.dot_dimension_numbers<[1], [0], [0], [1], [0, 0, 1, 1], [], []>} : vector<16x32xf32>, vector<32x32xf32>, vector<16x32xf32> -> vector<16x32xf32>
    %cst_59 = arith.constant dense<0.000000e+00> : vector<16x32xf32>
    %151 = tpu.matmul %1, %8, %cst_59 {dimension_numbers = #tpu.dot_dimension_numbers<[1], [0], [0], [1], [0, 0, 1, 1], [], []>} : vector<16x32xf32>, vector<32x32xf32>, vector<16x32xf32> -> vector<16x32xf32>
    %cst_60 = arith.constant dense<0.000000e+00> : vector<16x32xf32>
    %152 = tpu.matmul %2, %9, %cst_60 {dimension_numbers = #tpu.dot_dimension_numbers<[1], [0], [0], [1], [0, 0, 1, 1], [], []>} : vector<16x32xf32>, vector<32x32xf32>, vector<16x32xf32> -> vector<16x32xf32>
    %153 = vector.extract_strided_slice %150 {offsets = [0, 0], sizes = [16, 4], strides = [1, 1]} : vector<16x32xf32> to vector<16x4xf32>
    %154 = vector.extract_strided_slice %151 {offsets = [0, 0], sizes = [16, 4], strides = [1, 1]} : vector<16x32xf32> to vector<16x4xf32>
    %155 = vector.extract_strided_slice %152 {offsets = [0, 0], sizes = [16, 4], strides = [1, 1]} : vector<16x32xf32> to vector<16x4xf32>
    %156 = tpu.transpose %154, [1, 0] : vector<16x4xf32> -> vector<4x16xf32>
    %cst_61 = arith.constant dense<0.000000e+00> : vector<16x16xf32>
    %157 = tpu.matmul %153, %156, %cst_61 {dimension_numbers = #tpu.dot_dimension_numbers<[1], [0], [0], [1], [0, 0, 1, 1], [], []>} : vector<16x4xf32>, vector<4x16xf32>, vector<16x16xf32> -> vector<16x16xf32>
    %158 = arith.addf %157, %4 : vector<16x16xf32>
    %159 = math.exp %158 : vector<16x16xf32>
    %cst_62 = arith.constant dense<0.000000e+00> : vector<16xf32>
    %160 = vector.multi_reduction <add>, %159, %cst_62 [1] : vector<16x16xf32> to vector<16xf32>
    %161 = vector.shape_cast %160 : vector<16xf32> to vector<16x1xf32>
    %162 = vector.broadcast %161 : vector<16x1xf32> to vector<16x16xf32>
    %163 = arith.divf %159, %162 : vector<16x16xf32>
    %cst_63 = arith.constant dense<0.000000e+00> : vector<16x4xf32>
    %164 = tpu.matmul %163, %155, %cst_63 {dimension_numbers = #tpu.dot_dimension_numbers<[1], [0], [0], [1], [0, 0, 1, 1], [], []>} : vector<16x16xf32>, vector<16x4xf32>, vector<16x4xf32> -> vector<16x4xf32>
    %165 = vector.extract_strided_slice %150 {offsets = [0, 4], sizes = [16, 4], strides = [1, 1]} : vector<16x32xf32> to vector<16x4xf32>
    %166 = vector.extract_strided_slice %151 {offsets = [0, 4], sizes = [16, 4], strides = [1, 1]} : vector<16x32xf32> to vector<16x4xf32>
    %167 = vector.extract_strided_slice %152 {offsets = [0, 4], sizes = [16, 4], strides = [1, 1]} : vector<16x32xf32> to vector<16x4xf32>
    %168 = tpu.transpose %166, [1, 0] : vector<16x4xf32> -> vector<4x16xf32>
    %cst_64 = arith.constant dense<0.000000e+00> : vector<16x16xf32>
    %169 = tpu.matmul %165, %168, %cst_64 {dimension_numbers = #tpu.dot_dimension_numbers<[1], [0], [0], [1], [0, 0, 1, 1], [], []>} : vector<16x4xf32>, vector<4x16xf32>, vector<16x16xf32> -> vector<16x16xf32>
    %170 = arith.addf %169, %4 : vector<16x16xf32>
    %171 = math.exp %170 : vector<16x16xf32>
    %cst_65 = arith.constant dense<0.000000e+00> : vector<16xf32>
    %172 = vector.multi_reduction <add>, %171, %cst_65 [1] : vector<16x16xf32> to vector<16xf32>
    %173 = vector.shape_cast %172 : vector<16xf32> to vector<16x1xf32>
    %174 = vector.broadcast %173 : vector<16x1xf32> to vector<16x16xf32>
    %175 = arith.divf %171, %174 : vector<16x16xf32>
    %cst_66 = arith.constant dense<0.000000e+00> : vector<16x4xf32>
    %176 = tpu.matmul %175, %167, %cst_66 {dimension_numbers = #tpu.dot_dimension_numbers<[1], [0], [0], [1], [0, 0, 1, 1], [], []>} : vector<16x16xf32>, vector<16x4xf32>, vector<16x4xf32> -> vector<16x4xf32>
    %177 = vector.extract_strided_slice %150 {offsets = [0, 8], sizes = [16, 4], strides = [1, 1]} : vector<16x32xf32> to vector<16x4xf32>
    %178 = vector.extract_strided_slice %151 {offsets = [0, 8], sizes = [16, 4], strides = [1, 1]} : vector<16x32xf32> to vector<16x4xf32>
    %179 = vector.extract_strided_slice %152 {offsets = [0, 8], sizes = [16, 4], strides = [1, 1]} : vector<16x32xf32> to vector<16x4xf32>
    %180 = tpu.transpose %178, [1, 0] : vector<16x4xf32> -> vector<4x16xf32>
    %cst_67 = arith.constant dense<0.000000e+00> : vector<16x16xf32>
    %181 = tpu.matmul %177, %180, %cst_67 {dimension_numbers = #tpu.dot_dimension_numbers<[1], [0], [0], [1], [0, 0, 1, 1], [], []>} : vector<16x4xf32>, vector<4x16xf32>, vector<16x16xf32> -> vector<16x16xf32>
    %182 = arith.addf %181, %4 : vector<16x16xf32>
    %183 = math.exp %182 : vector<16x16xf32>
    %cst_68 = arith.constant dense<0.000000e+00> : vector<16xf32>
    %184 = vector.multi_reduction <add>, %183, %cst_68 [1] : vector<16x16xf32> to vector<16xf32>
    %185 = vector.shape_cast %184 : vector<16xf32> to vector<16x1xf32>
    %186 = vector.broadcast %185 : vector<16x1xf32> to vector<16x16xf32>
    %187 = arith.divf %183, %186 : vector<16x16xf32>
    %cst_69 = arith.constant dense<0.000000e+00> : vector<16x4xf32>
    %188 = tpu.matmul %187, %179, %cst_69 {dimension_numbers = #tpu.dot_dimension_numbers<[1], [0], [0], [1], [0, 0, 1, 1], [], []>} : vector<16x16xf32>, vector<16x4xf32>, vector<16x4xf32> -> vector<16x4xf32>
    %189 = vector.extract_strided_slice %150 {offsets = [0, 12], sizes = [16, 4], strides = [1, 1]} : vector<16x32xf32> to vector<16x4xf32>
    %190 = vector.extract_strided_slice %151 {offsets = [0, 12], sizes = [16, 4], strides = [1, 1]} : vector<16x32xf32> to vector<16x4xf32>
    %191 = vector.extract_strided_slice %152 {offsets = [0, 12], sizes = [16, 4], strides = [1, 1]} : vector<16x32xf32> to vector<16x4xf32>
    %192 = tpu.transpose %190, [1, 0] : vector<16x4xf32> -> vector<4x16xf32>
    %cst_70 = arith.constant dense<0.000000e+00> : vector<16x16xf32>
    %193 = tpu.matmul %189, %192, %cst_70 {dimension_numbers = #tpu.dot_dimension_numbers<[1], [0], [0], [1], [0, 0, 1, 1], [], []>} : vector<16x4xf32>, vector<4x16xf32>, vector<16x16xf32> -> vector<16x16xf32>
    %194 = arith.addf %193, %4 : vector<16x16xf32>
    %195 = math.exp %194 : vector<16x16xf32>
    %cst_71 = arith.constant dense<0.000000e+00> : vector<16xf32>
    %196 = vector.multi_reduction <add>, %195, %cst_71 [1] : vector<16x16xf32> to vector<16xf32>
    %197 = vector.shape_cast %196 : vector<16xf32> to vector<16x1xf32>
    %198 = vector.broadcast %197 : vector<16x1xf32> to vector<16x16xf32>
    %199 = arith.divf %195, %198 : vector<16x16xf32>
    %cst_72 = arith.constant dense<0.000000e+00> : vector<16x4xf32>
    %200 = tpu.matmul %199, %191, %cst_72 {dimension_numbers = #tpu.dot_dimension_numbers<[1], [0], [0], [1], [0, 0, 1, 1], [], []>} : vector<16x16xf32>, vector<16x4xf32>, vector<16x4xf32> -> vector<16x4xf32>
    %201 = vector.extract_strided_slice %150 {offsets = [0, 16], sizes = [16, 4], strides = [1, 1]} : vector<16x32xf32> to vector<16x4xf32>
    %202 = vector.extract_strided_slice %151 {offsets = [0, 16], sizes = [16, 4], strides = [1, 1]} : vector<16x32xf32> to vector<16x4xf32>
    %203 = vector.extract_strided_slice %152 {offsets = [0, 16], sizes = [16, 4], strides = [1, 1]} : vector<16x32xf32> to vector<16x4xf32>
    %204 = tpu.transpose %202, [1, 0] : vector<16x4xf32> -> vector<4x16xf32>
    %cst_73 = arith.constant dense<0.000000e+00> : vector<16x16xf32>
    %205 = tpu.matmul %201, %204, %cst_73 {dimension_numbers = #tpu.dot_dimension_numbers<[1], [0], [0], [1], [0, 0, 1, 1], [], []>} : vector<16x4xf32>, vector<4x16xf32>, vector<16x16xf32> -> vector<16x16xf32>
    %206 = arith.addf %205, %4 : vector<16x16xf32>
    %207 = math.exp %206 : vector<16x16xf32>
    %cst_74 = arith.constant dense<0.000000e+00> : vector<16xf32>
    %208 = vector.multi_reduction <add>, %207, %cst_74 [1] : vector<16x16xf32> to vector<16xf32>
    %209 = vector.shape_cast %208 : vector<16xf32> to vector<16x1xf32>
    %210 = vector.broadcast %209 : vector<16x1xf32> to vector<16x16xf32>
    %211 = arith.divf %207, %210 : vector<16x16xf32>
    %cst_75 = arith.constant dense<0.000000e+00> : vector<16x4xf32>
    %212 = tpu.matmul %211, %203, %cst_75 {dimension_numbers = #tpu.dot_dimension_numbers<[1], [0], [0], [1], [0, 0, 1, 1], [], []>} : vector<16x16xf32>, vector<16x4xf32>, vector<16x4xf32> -> vector<16x4xf32>
    %213 = vector.extract_strided_slice %150 {offsets = [0, 20], sizes = [16, 4], strides = [1, 1]} : vector<16x32xf32> to vector<16x4xf32>
    %214 = vector.extract_strided_slice %151 {offsets = [0, 20], sizes = [16, 4], strides = [1, 1]} : vector<16x32xf32> to vector<16x4xf32>
    %215 = vector.extract_strided_slice %152 {offsets = [0, 20], sizes = [16, 4], strides = [1, 1]} : vector<16x32xf32> to vector<16x4xf32>
    %216 = tpu.transpose %214, [1, 0] : vector<16x4xf32> -> vector<4x16xf32>
    %cst_76 = arith.constant dense<0.000000e+00> : vector<16x16xf32>
    %217 = tpu.matmul %213, %216, %cst_76 {dimension_numbers = #tpu.dot_dimension_numbers<[1], [0], [0], [1], [0, 0, 1, 1], [], []>} : vector<16x4xf32>, vector<4x16xf32>, vector<16x16xf32> -> vector<16x16xf32>
    %218 = arith.addf %217, %4 : vector<16x16xf32>
    %219 = math.exp %218 : vector<16x16xf32>
    %cst_77 = arith.constant dense<0.000000e+00> : vector<16xf32>
    %220 = vector.multi_reduction <add>, %219, %cst_77 [1] : vector<16x16xf32> to vector<16xf32>
    %221 = vector.shape_cast %220 : vector<16xf32> to vector<16x1xf32>
    %222 = vector.broadcast %221 : vector<16x1xf32> to vector<16x16xf32>
    %223 = arith.divf %219, %222 : vector<16x16xf32>
    %cst_78 = arith.constant dense<0.000000e+00> : vector<16x4xf32>
    %224 = tpu.matmul %223, %215, %cst_78 {dimension_numbers = #tpu.dot_dimension_numbers<[1], [0], [0], [1], [0, 0, 1, 1], [], []>} : vector<16x16xf32>, vector<16x4xf32>, vector<16x4xf32> -> vector<16x4xf32>
    %225 = vector.extract_strided_slice %150 {offsets = [0, 24], sizes = [16, 4], strides = [1, 1]} : vector<16x32xf32> to vector<16x4xf32>
    %226 = vector.extract_strided_slice %151 {offsets = [0, 24], sizes = [16, 4], strides = [1, 1]} : vector<16x32xf32> to vector<16x4xf32>
    %227 = vector.extract_strided_slice %152 {offsets = [0, 24], sizes = [16, 4], strides = [1, 1]} : vector<16x32xf32> to vector<16x4xf32>
    %228 = tpu.transpose %226, [1, 0] : vector<16x4xf32> -> vector<4x16xf32>
    %cst_79 = arith.constant dense<0.000000e+00> : vector<16x16xf32>
    %229 = tpu.matmul %225, %228, %cst_79 {dimension_numbers = #tpu.dot_dimension_numbers<[1], [0], [0], [1], [0, 0, 1, 1], [], []>} : vector<16x4xf32>, vector<4x16xf32>, vector<16x16xf32> -> vector<16x16xf32>
    %230 = arith.addf %229, %4 : vector<16x16xf32>
    %231 = math.exp %230 : vector<16x16xf32>
    %cst_80 = arith.constant dense<0.000000e+00> : vector<16xf32>
    %232 = vector.multi_reduction <add>, %231, %cst_80 [1] : vector<16x16xf32> to vector<16xf32>
    %233 = vector.shape_cast %232 : vector<16xf32> to vector<16x1xf32>
    %234 = vector.broadcast %233 : vector<16x1xf32> to vector<16x16xf32>
    %235 = arith.divf %231, %234 : vector<16x16xf32>
    %cst_81 = arith.constant dense<0.000000e+00> : vector<16x4xf32>
    %236 = tpu.matmul %235, %227, %cst_81 {dimension_numbers = #tpu.dot_dimension_numbers<[1], [0], [0], [1], [0, 0, 1, 1], [], []>} : vector<16x16xf32>, vector<16x4xf32>, vector<16x4xf32> -> vector<16x4xf32>
    %237 = vector.extract_strided_slice %150 {offsets = [0, 28], sizes = [16, 4], strides = [1, 1]} : vector<16x32xf32> to vector<16x4xf32>
    %238 = vector.extract_strided_slice %151 {offsets = [0, 28], sizes = [16, 4], strides = [1, 1]} : vector<16x32xf32> to vector<16x4xf32>
    %239 = vector.extract_strided_slice %152 {offsets = [0, 28], sizes = [16, 4], strides = [1, 1]} : vector<16x32xf32> to vector<16x4xf32>
    %240 = tpu.transpose %238, [1, 0] : vector<16x4xf32> -> vector<4x16xf32>
    %cst_82 = arith.constant dense<0.000000e+00> : vector<16x16xf32>
    %241 = tpu.matmul %237, %240, %cst_82 {dimension_numbers = #tpu.dot_dimension_numbers<[1], [0], [0], [1], [0, 0, 1, 1], [], []>} : vector<16x4xf32>, vector<4x16xf32>, vector<16x16xf32> -> vector<16x16xf32>
    %242 = arith.addf %241, %4 : vector<16x16xf32>
    %243 = math.exp %242 : vector<16x16xf32>
    %cst_83 = arith.constant dense<0.000000e+00> : vector<16xf32>
    %244 = vector.multi_reduction <add>, %243, %cst_83 [1] : vector<16x16xf32> to vector<16xf32>
    %245 = vector.shape_cast %244 : vector<16xf32> to vector<16x1xf32>
    %246 = vector.broadcast %245 : vector<16x1xf32> to vector<16x16xf32>
    %247 = arith.divf %243, %246 : vector<16x16xf32>
    %cst_84 = arith.constant dense<0.000000e+00> : vector<16x4xf32>
    %248 = tpu.matmul %247, %239, %cst_84 {dimension_numbers = #tpu.dot_dimension_numbers<[1], [0], [0], [1], [0, 0, 1, 1], [], []>} : vector<16x16xf32>, vector<16x4xf32>, vector<16x4xf32> -> vector<16x4xf32>
    %249 = tpu.concatenate %164, %176, %188, %200, %212, %224, %236, %248 in 1 : vector<16x4xf32>, vector<16x4xf32>, vector<16x4xf32>, vector<16x4xf32>, vector<16x4xf32>, vector<16x4xf32>, vector<16x4xf32>, vector<16x4xf32> -> vector<16x32xf32>
    %cst_85 = arith.constant dense<0.000000e+00> : vector<16x32xf32>
    %250 = tpu.matmul %249, %10, %cst_85 {dimension_numbers = #tpu.dot_dimension_numbers<[1], [0], [0], [1], [0, 0, 1, 1], [], []>} : vector<16x32xf32>, vector<32x32xf32>, vector<16x32xf32> -> vector<16x32xf32>
    %251 = vector.broadcast %16 : vector<1x32xf32> to vector<16x32xf32>
    %252 = arith.addf %250, %251 : vector<16x32xf32>
    %cst_86 = arith.constant dense<0.000000e+00> : vector<16xf32>
    %253 = vector.multi_reduction <add>, %252, %cst_86 [1] : vector<16x32xf32> to vector<16xf32>
    %254 = vector.shape_cast %253 : vector<16xf32> to vector<16x1xf32>
    %cst_87 = arith.constant 3.200000e+01 : f32
    %255 = vector.broadcast %cst_87 : f32 to vector<16x1xf32>
    %256 = arith.divf %254, %255 : vector<16x1xf32>
    %257 = vector.broadcast %256 : vector<16x1xf32> to vector<16x32xf32>
    %258 = arith.subf %252, %257 : vector<16x32xf32>
    %259 = arith.mulf %258, %258 : vector<16x32xf32>
    %cst_88 = arith.constant dense<0.000000e+00> : vector<16xf32>
    %260 = vector.multi_reduction <add>, %259, %cst_88 [1] : vector<16x32xf32> to vector<16xf32>
    %261 = vector.shape_cast %260 : vector<16xf32> to vector<16x1xf32>
    %cst_89 = arith.constant 3.200000e+01 : f32
    %262 = vector.broadcast %cst_89 : f32 to vector<16x1xf32>
    %263 = arith.divf %261, %262 : vector<16x1xf32>
    %264 = vector.broadcast %256 : vector<16x1xf32> to vector<16x32xf32>
    %265 = arith.subf %252, %264 : vector<16x32xf32>
    %cst_90 = arith.constant 9.99999974E-6 : f32
    %266 = vector.broadcast %cst_90 : f32 to vector<16x1xf32>
    %267 = arith.addf %263, %266 : vector<16x1xf32>
    %268 = math.rsqrt %267 : vector<16x1xf32>
    %269 = vector.broadcast %268 : vector<16x1xf32> to vector<16x32xf32>
    %270 = arith.mulf %265, %269 : vector<16x32xf32>
    %271 = vector.broadcast %17 : vector<1x32xf32> to vector<16x32xf32>
    %272 = arith.mulf %270, %271 : vector<16x32xf32>
    %273 = vector.broadcast %18 : vector<1x32xf32> to vector<16x32xf32>
    %274 = arith.addf %272, %273 : vector<16x32xf32>
    %cst_91 = arith.constant dense<0.000000e+00> : vector<16x128xf32>
    %275 = tpu.matmul %274, %11, %cst_91 {dimension_numbers = #tpu.dot_dimension_numbers<[1], [0], [0], [1], [0, 0, 1, 1], [], []>} : vector<16x32xf32>, vector<32x128xf32>, vector<16x128xf32> -> vector<16x128xf32>
    %276 = vector.broadcast %21 : vector<1x128xf32> to vector<16x128xf32>
    %277 = arith.addf %275, %276 : vector<16x128xf32>
    %cst_92 = arith.constant 0.000000e+00 : f32
    %278 = vector.broadcast %cst_92 : f32 to vector<16x128xf32>
    %279 = arith.maximumf %277, %278 : vector<16x128xf32>
    %cst_93 = arith.constant dense<0.000000e+00> : vector<16x32xf32>
    %280 = tpu.matmul %279, %12, %cst_93 {dimension_numbers = #tpu.dot_dimension_numbers<[1], [1], [0], [0], [0, 0, 1, 0], [], []>} : vector<16x128xf32>, vector<32x128xf32>, vector<16x32xf32> -> vector<16x32xf32>
    %281 = vector.broadcast %22 : vector<1x32xf32> to vector<16x32xf32>
    %282 = arith.addf %280, %281 : vector<16x32xf32>
    %283 = arith.addf %282, %274 : vector<16x32xf32>
    %cst_94 = arith.constant dense<0.000000e+00> : vector<16xf32>
    %284 = vector.multi_reduction <add>, %283, %cst_94 [1] : vector<16x32xf32> to vector<16xf32>
    %285 = vector.shape_cast %284 : vector<16xf32> to vector<16x1xf32>
    %cst_95 = arith.constant 3.200000e+01 : f32
    %286 = vector.broadcast %cst_95 : f32 to vector<16x1xf32>
    %287 = arith.divf %285, %286 : vector<16x1xf32>
    %288 = vector.broadcast %287 : vector<16x1xf32> to vector<16x32xf32>
    %289 = arith.subf %283, %288 : vector<16x32xf32>
    %290 = arith.mulf %289, %289 : vector<16x32xf32>
    %cst_96 = arith.constant dense<0.000000e+00> : vector<16xf32>
    %291 = vector.multi_reduction <add>, %290, %cst_96 [1] : vector<16x32xf32> to vector<16xf32>
    %292 = vector.shape_cast %291 : vector<16xf32> to vector<16x1xf32>
    %cst_97 = arith.constant 3.200000e+01 : f32
    %293 = vector.broadcast %cst_97 : f32 to vector<16x1xf32>
    %294 = arith.divf %292, %293 : vector<16x1xf32>
    %295 = vector.broadcast %287 : vector<16x1xf32> to vector<16x32xf32>
    %296 = arith.subf %283, %295 : vector<16x32xf32>
    %cst_98 = arith.constant 9.99999974E-6 : f32
    %297 = vector.broadcast %cst_98 : f32 to vector<16x1xf32>
    %298 = arith.addf %294, %297 : vector<16x1xf32>
    %299 = math.rsqrt %298 : vector<16x1xf32>
    %300 = vector.broadcast %299 : vector<16x1xf32> to vector<16x32xf32>
    %301 = arith.mulf %296, %300 : vector<16x32xf32>
    %302 = vector.broadcast %19 : vector<1x32xf32> to vector<16x32xf32>
    %303 = arith.mulf %301, %302 : vector<16x32xf32>
    %304 = vector.broadcast %20 : vector<1x32xf32> to vector<16x32xf32>
    %305 = arith.addf %303, %304 : vector<16x32xf32>
    %c0_99 = arith.constant 0 : index
    %c0_100 = arith.constant 0 : index
    %306 = vector.load %arg6[%c0_99, %c0_100] : memref<16x32xf32, #tpu.memory_space<vmem>>, vector<16x32xf32>
    tpu.vector_store %arg6[%c0_99, %c0_100], %305 {strides = array<i32>} : memref<16x32xf32, #tpu.memory_space<vmem>>, vector<16x32xf32>,
    return
  }
}

</mosaic_0001>

<bundles_post_ra>
// kernel: decoder_block.1
= control target key start
LH: loop header
LB: loop body
LE: loop exit
PB: predicated region body
PF: predicated region fallthrough
CT: control target
= control target key end

     0   :  { %11 = vsyncpa [#allocation3], 0  ;;  %s6253_s0 = inlined_call_operand.hbm [shape: f32[16,32], index: 0, kind: input, shape index: {}]   ;;  %s6254_s1 = inlined_call_operand.hbm [shape: f32[16,32], index: 1, kind: input, shape index: {}]   ;;  %s6255_s2 = inlined_call_operand.vmem [shape: f32[16,32], index: 2, kind: input, shape index: {}]   ;;  %s6256_s3 = inlined_call_operand.hbm [shape: f32[16,32], index: 3, kind: input, shape index: {}]   ;;  %s6257_s4 = inlined_call_operand.hbm [shape: f32[32,512], index: 4, kind: input, shape index: {}]   ;;  %s6258_s5 = inlined_call_operand.hbm [shape: f32[10,128], index: 5, kind: input, shape index: {}]   ;;  %s6259_s6 = inlined_call_operand.hbm [shape: f32[16,32], index: 6, kind: output, shape index: {}]  }
   0x1   :  { %12 = vsyncpa [#allocation6], 0 }
   0x2   :  { %13 = vsyncpa [#allocation9], 0 }
   0x3   :  { %14 = vsyncpa [#allocation4], 0  ;;  %s5541_s21 = smov [#allocation5]   ;;  %s5542_s23 = smov [#allocation8]  }
   0x4   :  { %s32_s22 = sshll.u32 %s5541_s21, 4  ;;  %s58_s24 = sshll.u32 %s5542_s23, 4  ;;  %s33_s22 = int_to_ptr.vmem [resolvable:$true] %s32_s22  ;;  %s5615_s24 = int_to_ptr.vmem [resolvable:$true] %s58_s24 }
   0x5   :  { %s5401_s27 = scalar_lea.hbm %s6254_s1, 256 }
   0x6   :  { %p5402_p0 = scmp.ne.s32.totalorder %s6254_s1, %s5401_s27  ;;  %p5405_p1 = scmp.lt.u32.totalorder %s5401_s27, %s6254_s1 }
   0x8   :  { %p5407_p2 = pnand %p5405_p1, %p5402_p0 }
   0xa   :  { %5410 = shalt.err (!%p5407_p2)
}
   0xb   :  { %s5411_s8 = scalar_lea.vmem %s33_s22, 256  ;;  %p5416_p4 = scmp.lt.s32.totalorder %s33_s22, %s33_s22 }
   0xc   :  { %p5412_p3 = scmp.ne.s32.totalorder %s33_s22, %s5411_s8  ;;  %p5417_p5 = scmp.lt.s32.totalorder %s5411_s8, %s5411_s8 }
   0xe   :  { %p5418_p6 = por %p5417_p5, %p5416_p4 }
  0x10   :  { %p5419_p7 = pnand %p5418_p6, %p5412_p3 }
  0x12   :  { %5422 = shalt.err (!%p5419_p7)
}
  0x13   :  { %s5543_s9 = smov 128   ;;  %s5544_s10 = smov 8  }
  0x14   :  { %38 = dma.hbm_to_vmem [thread:$0]  %s6254_s1, 256, %s33_s22, [#allocation6], %s5543_s9, %s5543_s9, %s5544_s10  }
  0x15   :  { %s5423_s15 = scalar_lea.hbm %s6257_s4, 2048 }
  0x16   :  { %p5424_p8 = scmp.ne.s32.totalorder %s6257_s4, %s5423_s15  ;;  %p5427_p9 = scmp.lt.u32.totalorder %s5423_s15, %s6257_s4 }
  0x18   :  { %p5429_p10 = pnand %p5427_p9, %p5424_p8 }
  0x1a   :  { %5432 = shalt.err (!%p5429_p10)
}
  0x1b   :  { %s5433_s20 = scalar_lea.vmem %s5615_s24, 2048  ;;  %p5438_p12 = scmp.lt.s32.totalorder %s5615_s24, %s5615_s24 }
  0x1c   :  { %p5434_p11 = scmp.ne.s32.totalorder %s5615_s24, %s5433_s20  ;;  %p5439_p13 = scmp.lt.s32.totalorder %s5433_s20, %s5433_s20 }
  0x1e   :  { %p5440_p0 = por %p5439_p13, %p5438_p12 }
  0x20   :  { %p5441_p1 = pnand %p5440_p0, %p5434_p11 }
  0x22   :  { %5444 = shalt.err (!%p5441_p1)
}
  0x23   :  { %s5545_s1 = smov 512   ;;  %s5546_s21 = smov 32  }
  0x24   :  { %64 = dma.hbm_to_vmem [thread:$0]  %s6257_s4, 2048, %s5615_s24, [#allocation9], %s5545_s1, %s5545_s1, %s5546_s21  }
  0x25   :  { %s5547_s25 = smov [#allocation2]   ;;  %s5548_s27 = smov [#allocation7]  }
  0x26   :  { %s20_s26 = sshll.u32 %s5547_s25, 4  ;;  %s46_s28 = sshll.u32 %s5548_s27, 4  ;;  %s21_s26 = int_to_ptr.vmem [resolvable:$true] %s20_s26  ;;  %s5650_s28 = int_to_ptr.vmem [resolvable:$true] %s46_s28 }
  0x27   :  { %s5445_s7 = scalar_lea.hbm %s6253_s0, 256 }
  0x28   :  { %p5446_p2 = scmp.ne.s32.totalorder %s6253_s0, %s5445_s7  ;;  %p5449_p3 = scmp.lt.u32.totalorder %s5445_s7, %s6253_s0 }
  0x2a   :  { %p5451_p4 = pnand %p5449_p3, %p5446_p2 }
  0x2c   :  { %5454 = shalt.err (!%p5451_p4)
}
  0x2d   :  { %s5455_s4 = scalar_lea.vmem %s21_s26, 256  ;;  %p5460_p6 = scmp.lt.s32.totalorder %s21_s26, %s21_s26 }
  0x2e   :  { %p5456_p5 = scmp.ne.s32.totalorder %s21_s26, %s5455_s4  ;;  %p5461_p7 = scmp.lt.s32.totalorder %s5455_s4, %s5455_s4 }
  0x30   :  { %p5462_p8 = por %p5461_p7, %p5460_p6 }
  0x32   :  { %p5463_p9 = pnand %p5462_p8, %p5456_p5 }
  0x34   :  { %5466 = shalt.err (!%p5463_p9)
}
  0x35   :  { %26 = dma.hbm_to_vmem [thread:$0]  %s6253_s0, 256, %s21_s26, [#allocation3], %s5543_s9, %s5543_s9, %s5544_s10  }
  0x36   :  { %s5467_s17 = scalar_lea.hbm %s6256_s3, 256 }
  0x37   :  { %p5468_p10 = scmp.ne.s32.totalorder %s6256_s3, %s5467_s17  ;;  %p5471_p11 = scmp.lt.u32.totalorder %s5467_s17, %s6256_s3 }
  0x39   :  { %p5473_p12 = pnand %p5471_p11, %p5468_p10 }
  0x3b   :  { %5476 = shalt.err (!%p5473_p12)
}
  0x3c   :  { %s5477_s22 = scalar_lea.vmem %s5650_s28, 256  ;;  %p5482_p0 = scmp.lt.s32.totalorder %s5650_s28, %s5650_s28 }
  0x3d   :  { %p5478_p13 = scmp.ne.s32.totalorder %s5650_s28, %s5477_s22  ;;  %p5483_p1 = scmp.lt.s32.totalorder %s5477_s22, %s5477_s22 }
  0x3f   :  { %p5484_p2 = por %p5483_p1, %p5482_p0 }
  0x41   :  { %p5485_p3 = pnand %p5484_p2, %p5478_p13 }
  0x43   :  { %5488 = shalt.err (!%p5485_p3)
}
  0x44   :  { %52 = dma.hbm_to_vmem [thread:$0]  %s6256_s3, 256, %s5650_s28, [#allocation6], %s5543_s9, %s5543_s9, %s5544_s10  }
  0x45   :  { %s5549_s25 = smov [#allocation10]   ;;  %s5489_s30 = scalar_lea.hbm %s6258_s5, 256 }
  0x46   :  { %s70_s26 = sshll.u32 %s5549_s25, 4  ;;  %p5490_p4 = scmp.ne.s32.totalorder %s6258_s5, %s5489_s30  ;;  %s71_s26 = int_to_ptr.vmem [resolvable:$true] %s70_s26 }
  0x47   :  { %p5493_p5 = scmp.lt.u32.totalorder %s5489_s30, %s6258_s5 }
  0x49   :  { %p5495_p6 = pnand %p5493_p5, %p5490_p4 }
  0x4b   :  { %5498 = shalt.err (!%p5495_p6)
}
  0x4c   :  { %s5499_s13 = scalar_lea.vmem %s71_s26, 256  ;;  %p5504_p8 = scmp.lt.s32.totalorder %s71_s26, %s71_s26 }
  0x4d   :  { %p5500_p7 = scmp.ne.s32.totalorder %s71_s26, %s5499_s13  ;;  %p5505_p9 = scmp.lt.s32.totalorder %s5499_s13, %s5499_s13 }
  0x4f   :  { %p5506_p10 = por %p5505_p9, %p5504_p8 }
  0x51   :  { %p5507_p11 = pnand %p5506_p10, %p5500_p7 }
  0x53   :  { %5510 = shalt.err (!%p5507_p11)
}
  0x54   :  { %76 = dma.hbm_to_vmem [thread:$0]  %s6258_s5, 256, %s71_s26, [#allocation9], %s5543_s9, %s5543_s9, %s5544_s10  }
  0x55   :  { %5533 = dma.done.wait [#allocation3], 256  }
  0x56   :  { %5534 = vsyncadd [#allocation3], 4294967040 }
  0x57   :  { %5535 = dma.done.wait [#allocation6], 512  }
  0x58   :  { %5536 = vsyncadd [#allocation6], 4294966784 }
  0x59   :  { %5537 = dma.done.wait [#allocation9], 2304  }
  0x5a   :  { %5538 = vsyncadd [#allocation9], 4294964992  ;;  %vm126_vm0 = vcmask 261120   ;;  %v5702_v0 = vld [vmem:[#allocation8] sm:$0xff]  ;;  %v5712_v5 = vld [vmem:[#allocation2] sm:$0xff]  ;;  %vm214_vm1 = vcmask 31744  }
  0x5b   :  { %v5704_v1 = vld [vmem:[#allocation8 + $0x20] sm:$0xff]  ;;  %4504 = vmatprep.mubr.msk.f32.mxu1 %vm126_vm0, %v5712_v5  ;;  %v5718_v7 = vld [vmem:[#allocation2 + $0x8] sm:$0xff]  ;;  %s5550_s5 = smov 124   ;;  %s5551_s4 = smov 96   ;;  %vm5743_vm2 = vmpackc.low %vm214_vm1, %vm214_vm1  ;;  %vm302_vm3 = vcmask 130048   ;;  %vm1802_vm4 = vcmask 64512  }
  0x5c   :  { %v5706_v2 = vld [vmem:[#allocation8 + $0x40] sm:$0xff]  ;;  %v4808_v3 = vpack.c.bf16 %v5704_v1, %v5702_v0  ;;  %s5552_s24 = smov 92   ;;  %s5553_s14 = smov 64   ;;  %v5759_v26 = vld [vmem:[#allocation7 + $0x8] sm:$0xff]  ;;  %v5761_v27 = vld [vmem:[#allocation7] sm:$0xff]  ;;  %vm1805_vm5 = vcmask 97280  }
  0x5d   :  { %v5710_v4 = vld [vmem:[#allocation8 + $0x60] sm:$0xff]  ;;  %s5554_s15 = smov 88   ;;  %s5555_s16 = smov 120   ;;  %vm1810_vm6 = vcmask 162816   ;;  %vm1813_vm7 = vcmask 195584   ;;  %vm1816_vm8 = vcmask 228352  }
  0x5e   :  { %v4812_v6 = vpack.c.bf16 %v5710_v4, %v5706_v2  ;;  %4809 = vmatprep.subr.bf16.mxu1 %v4808_v3  ;;  %s5556_s17 = smov 84   ;;  %s5557_s18 = smov 60  }
  0x5f   :  { %4811 = vmatpush3.bf16.msra.mxu1 %v4808_v3  ;;  %s5558_s19 = smov 116   ;;  %s5559_s20 = smov 56  }
  0x60   :  { %4813 = vmatprep.subr.bf16.mxu1 %v4812_v6  ;;  %s5560_s1 = smov 80   ;;  %s5561_s22 = smov 112  }
  0x61   :  { %s5562_s0 = smov 52   ;;  %s5563_s23 = smov 76  }
  0x62   :  { %s5564_s25 = smov 108   ;;  %s5565_s26 = smov 48  }
  0x63   :  { %4815 = vmatpush3.bf16.msra.mxu1 %v4812_v6  ;;  %s5566_s27 = smov 72   ;;  %s5567_s29 = smov 104  }
  0x64   :  { %s5568_s30 = smov 44   ;;  %s5569_s7 = smov 68  }
  0x65   :  { %s5570_s8 = smov 100   ;;  %s5571_s11 = smov 40  }
  0x66   :  { %4505 = vmatmul.mubr.msk.f32.vlgmr.msra.gmra.mrb[0].mxu1 %vm126_vm0, %v5718_v7  ;;  %s5572_s12 = smov 36   ;;  %s5573_s13 = smov 4  }
  0x67   :  { %s5574_s3 = smov 12   ;;  %s5575_s28 = smov 16  }
 0x139   :  { %v5722_v8 = vpop.f32.mrb[0].mxu1 }
 0x13a   :  { %v5724_v9 = vpop.f32.mrb[1].mxu1 }
 0x13b   :  { %400 = vrot.lane.b32.xlu1 %v5724_v9, %s5550_s5  ;;  %4511 = vmatprep.mubr.msk.f32.mxu1 %vm214_vm1, %v5724_v9  ;;  %v5732_v10 = vpack.i.bf16 %v5722_v8, %v5724_v9 }
 0x13d   :  { %5072 = vrot.lane.b32.xlu0 %v5732_v10, %s5551_s4 }
 0x13f   :  { %402 = vrot.lane.b32.xlu1 %v5722_v8, %s5550_s5 }
 0x141   :  { %5077 = vrot.lane.b32.xlu0 %v5732_v10, %s5552_s24  ;;  %s5576_s24 = smov 20  }
 0x143   :  { %5082 = vrot.lane.b32.xlu1 %v5732_v10, %s5553_s14 }
 0x1ad   :  { %v401_v11 = vpop.permute.xlu1 %400 }
 0x1af   :  { %v5073_v12 = vpop.permute.xlu0 %5072 }
 0x1b0   :  { %v5075_v13 = vunpack.i.h.bf16 %v5073_v12  ;;  %v5074_v14 = vunpack.i.l.bf16 %v5073_v12 }
 0x1b1   :  { %v403_v15 = vpop.permute.xlu1 %402 }
 0x1b2   :  { %v4816_v17 = vpack.c.bf16 %v5075_v13, %v5074_v14 }
 0x1b3   :  { %v5078_v18 = vpop.permute.xlu0 %5077 }
 0x1b4   :  { %v5080_v19 = vunpack.i.h.bf16 %v5078_v18  ;;  %v5079_v20 = vunpack.i.l.bf16 %v5078_v18  ;;  %4818 = vmatprep.subr.msk.bf16.mxu1 %vm5743_vm2, %v4816_v17 }
 0x1b5   :  { %v5083_v21 = vpop.permute.xlu1 %5082  ;;  %4821 = vmatpush3.bf16.xpose.msk.msra.mxu1 %vm5743_vm2, %v4816_v17 }
 0x1b6   :  { %v4826_v22 = vpack.c.bf16 %v5080_v19, %v5079_v20  ;;  %v5085_v23 = vunpack.i.h.bf16 %v5083_v21  ;;  %v5084_v24 = vunpack.i.l.bf16 %v5083_v21 }
 0x1b8   :  { %4828 = vmatprep.subr.msk.bf16.mxu1 %vm5743_vm2, %v4826_v22  ;;  %v4822_v25 = vpack.c.bf16 %v5085_v23, %v5084_v24 }
 0x1ba   :  { %4823 = vmatprep.subr.bf16.mxu0 %v4822_v25 }
 0x1bb   :  { %4825 = vmatpush3.bf16.msra.mxu0 %v4822_v25 }
 0x1bc   :  { %4512 = vmatmul.mubr.msk.f32.vlgmr.msra.gmra.mrb[2].mxu1 %vm214_vm1, %v5722_v8 }
 0x1bd   :  { %4831 = vmatpush3.bf16.xpose.msk.msra.mxu1 %vm5743_vm2, %v4826_v22  ;;  %4525 = vmatprep.mubr.msk.f32.mxu1 %vm214_vm1, %v401_v11 }
 0x1c4   :  { %4526 = vmatmul.mubr.msk.f32.vlgmr.msra.gmra.mrb[4].mxu1 %vm214_vm1, %v403_v15 }
 0x28f   :  { %v4513_v28 = vpop.f32.mrb[2].mxu1 }
 0x290   :  { %v295_v29 = vadd.f32 %v4513_v28, %v5759_v26  ;;  %v289_v30 = vpop.f32.mrb[3].mxu1 }
 0x291   :  { %v290_v31 = vadd.f32 %v289_v30, %v5761_v27 }
 0x292   :  { %v300_v32 = vmul.f32 1.442695, %v295_v29 }
 0x293   :  { %v298_v33 = vmul.f32 1.442695, %v290_v31 }
 0x294   :  { %5261 = vpow2.f32 %v300_v32 }
 0x295   :  { %5263 = vpow2.f32 %v298_v33 }
 0x297   :  { %v4527_v34 = vpop.f32.mrb[4].mxu1 }
 0x298   :  { %v488_v35 = vadd.f32 %v4527_v34, %v5759_v26  ;;  %v482_v36 = vpop.f32.mrb[5].mxu1 }
 0x299   :  { %v483_v37 = vadd.f32 %v482_v36, %v5761_v27 }
 0x29a   :  { %v493_v38 = vmul.f32 1.442695, %v488_v35 }
 0x29b   :  { %v491_v39 = vmul.f32 1.442695, %v483_v37 }
 0x29c   :  { %5265 = vpow2.f32 %v493_v38 }
 0x29d   :  { %5267 = vpow2.f32 %v491_v39 }
 0x29e   :  { %v5262_v40 = vpop.eup %5261 }
 0x29f   :  { %v5264_v41 = vpop.eup %5263  ;;  %v306_v42 = vsel %vm302_vm3, %v5262_v40, 0.0 }
 0x2a0   :  { %307 = vadd.xlane.f32.xlu1 %v306_v42  ;;  %v303_v43 = vsel %vm302_vm3, %v5264_v41, 0.0 }
 0x2a1   :  { %304 = vadd.xlane.f32.xlu0 %v303_v43 }
 0x2a6   :  { %v5266_v44 = vpop.eup %5265 }
 0x2a7   :  { %v498_v45 = vsel %vm302_vm3, %v5266_v44, 0.0  ;;  %v5268_v46 = vpop.eup %5267 }
 0x2a8   :  { %499 = vadd.xlane.f32.xlu0 %v498_v45  ;;  %v495_v47 = vsel %vm302_vm3, %v5268_v46, 0.0 }
 0x2ac   :  { %496 = vadd.xlane.f32.xlu0 %v495_v47 }
 0x2b1   :  { %5092 = vrot.lane.b32.xlu1 %v5732_v10, %s5554_s15  ;;  %s5577_s15 = smov 24  }
 0x2b5   :  { %592 = vrot.lane.b32.xlu1 %v5724_v9, %s5555_s16 }
 0x2b9   :  { %5102 = vrot.lane.b32.xlu1 %v5732_v10, %s5556_s17  ;;  %s5578_s17 = smov 28  }
 0x2c2   :  { %5087 = vrot.lane.b32.xlu0 %v5732_v10, %s5557_s18 }
 0x2c6   :  { %594 = vrot.lane.b32.xlu0 %v5722_v8, %s5555_s16 }
 0x32d   :  { %v308_v48 = vpop.xlane.xlu1 %307 }
 0x32e   :  { %5269 = vrcp.f32 %v308_v48  ;;  %v305_v49 = vpop.xlane.xlu0 %304 }
 0x32f   :  { %5271 = vrcp.f32 %v305_v49 }
 0x331   :  { %v5093_v55 = vpop.permute.xlu1 %5092 }
 0x332   :  { %v5095_v58 = vunpack.i.h.bf16 %v5093_v55  ;;  %v5094_v59 = vunpack.i.l.bf16 %v5093_v55 }
 0x334   :  { %v4836_v63 = vpack.c.bf16 %v5095_v58, %v5094_v59 }
 0x335   :  { %v500_v50 = vpop.xlane.xlu0 %499  ;;  %v593_v13 = vpop.permute.xlu1 %592 }
 0x336   :  { %5273 = vrcp.f32 %v500_v50 }
 0x338   :  { %v5270_v51 = vpop.eup %5269 }
 0x339   :  { %v5272_v52 = vpop.eup %5271  ;;  %v497_v53 = vpop.xlane.xlu0 %496  ;;  %v312_v56 = vmul.f32 %v5270_v51, %v5262_v40 }
 0x33a   :  { %5275 = vrcp.f32 %v497_v53  ;;  %v310_v54 = vmul.f32 %v5272_v52, %v5264_v41  ;;  %v5103_v32 = vpop.permute.xlu1 %5102 }
 0x33b   :  { %v5105_v36 = vunpack.i.h.bf16 %v5103_v32  ;;  %v5104_v37 = vunpack.i.l.bf16 %v5103_v32 }
 0x33c   :  { %4518 = vmatprep.mubr.msk.f32.mxu0 %vm302_vm3, %v310_v54 }
 0x33d   :  { %4519 = vmatmul.mubr.msk.f32.vlgmr.msra.gmra.mrb[0].mxu0 %vm302_vm3, %v312_v56  ;;  %v5088_v57 = vpop.permute.xlu0 %5087  ;;  %v4846_v41 = vpack.c.bf16 %v5105_v36, %v5104_v37 }
 0x33e   :  { %v5090_v60 = vunpack.i.h.bf16 %v5088_v57  ;;  %v5089_v61 = vunpack.i.l.bf16 %v5088_v57 }
 0x340   :  { %v4832_v62 = vpack.c.bf16 %v5090_v60, %v5089_v61  ;;  %v5274_v3 = vpop.eup %5273 }
 0x341   :  { %v504_v12 = vmul.f32 %v5274_v3, %v5266_v44  ;;  %v595_v14 = vpop.permute.xlu0 %594 }
 0x342   :  { %4833 = vmatprep.subr.bf16.mxu0 %v4832_v62 }
 0x343   :  { %4835 = vmatpush3.bf16.msra.mxu0 %v4832_v62 }
 0x344   :  { %v5276_v6 = vpop.eup %5275  ;;  %4838 = vmatprep.subr.msk.bf16.mxu0 %vm5743_vm2, %v4836_v63 }
 0x345   :  { %v502_v11 = vmul.f32 %v5276_v6, %v5268_v46 }
 0x347   :  { %4532 = vmatprep.mubr.msk.f32.mxu0 %vm302_vm3, %v502_v11 }
 0x348   :  { %4533 = vmatmul.mubr.msk.f32.vlgmr.msra.gmra.mrb[2].mxu0 %vm302_vm3, %v504_v12 }
 0x349   :  { %4539 = vmatprep.mubr.msk.f32.mxu0 %vm214_vm1, %v593_v13 }
 0x34c   :  { %4841 = vmatpush3.bf16.xpose.msk.msra.mxu0 %vm5743_vm2, %v4836_v63 }
 0x353   :  { %4540 = vmatmul.mubr.msk.f32.vlgmr.msra.gmra.mrb[4].mxu0 %vm214_vm1, %v595_v14 }
 0x410   :  { %v5788_v15 = vpop.f32.mrb[0].mxu0 }
 0x411   :  { %v5790_v17 = vpop.f32.mrb[1].mxu0 }
 0x41b   :  { %v5792_v18 = vpop.f32.mrb[2].mxu0 }
 0x41c   :  { %v5794_v19 = vpop.f32.mrb[3].mxu0 }
 0x426   :  { %v4541_v20 = vpop.f32.mrb[4].mxu0 }
 0x427   :  { %v680_v21 = vadd.f32 %v4541_v20, %v5759_v26  ;;  %v674_v22 = vpop.f32.mrb[5].mxu0 }
 0x428   :  { %v675_v23 = vadd.f32 %v674_v22, %v5761_v27 }
 0x429   :  { %v685_v24 = vmul.f32 1.442695, %v680_v21 }
 0x42a   :  { %v683_v25 = vmul.f32 1.442695, %v675_v23 }
 0x42b   :  { %5277 = vpow2.f32 %v685_v24 }
 0x42c   :  { %5279 = vpow2.f32 %v683_v25 }
 0x435   :  { %v5278_v28 = vpop.eup %5277 }
 0x436   :  { %v5280_v29 = vpop.eup %5279  ;;  %v690_v30 = vsel %vm302_vm3, %v5278_v28, 0.0 }
 0x437   :  { %691 = vadd.xlane.f32.xlu0 %v690_v30  ;;  %v687_v31 = vsel %vm302_vm3, %v5280_v29, 0.0 }
 0x438   :  { %688 = vadd.xlane.f32.xlu1 %v687_v31 }
 0x449   :  { %784 = vrot.lane.b32.xlu1 %v5724_v9, %s5558_s19 }
 0x44d   :  { %5097 = vrot.lane.b32.xlu0 %v5732_v10, %s5559_s20  ;;  %5112 = vrot.lane.b32.xlu1 %v5732_v10, %s5560_s1 }
 0x451   :  { %786 = vrot.lane.b32.xlu0 %v5722_v8, %s5558_s19 }
 0x4c4   :  { %v692_v33 = vpop.xlane.xlu0 %691 }
 0x4c5   :  { %5281 = vrcp.f32 %v692_v33  ;;  %v689_v34 = vpop.xlane.xlu1 %688 }
 0x4c6   :  { %5283 = vrcp.f32 %v689_v34 }
 0x4c8   :  { %v5098_v35 = vpop.permute.xlu0 %5097 }
 0x4c9   :  { %v5100_v38 = vunpack.i.h.bf16 %v5098_v35  ;;  %v5099_v39 = vunpack.i.l.bf16 %v5098_v35  ;;  %v785_v46 = vpop.permute.xlu1 %784 }
 0x4cb   :  { %v4842_v40 = vpack.c.bf16 %v5100_v38, %v5099_v39 }
 0x4cc   :  { %v787_v47 = vpop.permute.xlu0 %786 }
 0x4cd   :  { %4843 = vmatprep.subr.bf16.mxu1 %v4842_v40  ;;  %v5113_v60 = vpop.permute.xlu1 %5112 }
 0x4ce   :  { %4845 = vmatpush3.bf16.msra.mxu1 %v4842_v40  ;;  %v5115_v3 = vunpack.i.h.bf16 %v5113_v60  ;;  %v5114_v6 = vunpack.i.l.bf16 %v5113_v60 }
 0x4cf   :  { %v5282_v42 = vpop.eup %5281  ;;  %4848 = vmatprep.subr.msk.bf16.mxu1 %vm5743_vm2, %v4846_v41 }
 0x4d0   :  { %v5284_v43 = vpop.eup %5283  ;;  %v696_v45 = vmul.f32 %v5282_v42, %v5278_v28  ;;  %v4856_v14 = vpack.c.bf16 %v5115_v3, %v5114_v6 }
 0x4d1   :  { %v694_v44 = vmul.f32 %v5284_v43, %v5280_v29 }
 0x4d3   :  { %4546 = vmatprep.mubr.msk.f32.mxu1 %vm302_vm3, %v694_v44 }
 0x4d4   :  { %4547 = vmatmul.mubr.msk.f32.vlgmr.msra.gmra.mrb[6].mxu1 %vm302_vm3, %v696_v45 }
 0x4d5   :  { %4553 = vmatprep.mubr.msk.f32.mxu1 %vm214_vm1, %v785_v46 }
 0x4d7   :  { %4851 = vmatpush3.bf16.xpose.msk.msra.mxu1 %vm5743_vm2, %v4846_v41 }
 0x4de   :  { %4554 = vmatmul.mubr.msk.f32.vlgmr.msra.gmra.mrb[8].mxu1 %vm214_vm1, %v787_v47 }
 0x5a7   :  { %v5814_v48 = vpop.f32.mrb[6].mxu1 }
 0x5a8   :  { %v5816_v49 = vpop.f32.mrb[7].mxu1 }
 0x5b1   :  { %v4555_v50 = vpop.f32.mrb[8].mxu1 }
 0x5b2   :  { %v872_v51 = vadd.f32 %v4555_v50, %v5759_v26  ;;  %v866_v52 = vpop.f32.mrb[9].mxu1 }
 0x5b3   :  { %v867_v53 = vadd.f32 %v866_v52, %v5761_v27 }
 0x5b4   :  { %v877_v54 = vmul.f32 1.442695, %v872_v51 }
 0x5b5   :  { %v875_v55 = vmul.f32 1.442695, %v867_v53 }
 0x5b6   :  { %5285 = vpow2.f32 %v877_v54 }
 0x5b7   :  { %5287 = vpow2.f32 %v875_v55 }
 0x5c0   :  { %v5286_v56 = vpop.eup %5285 }
 0x5c1   :  { %v5288_v57 = vpop.eup %5287  ;;  %v882_v58 = vsel %vm302_vm3, %v5286_v56, 0.0 }
 0x5c2   :  { %883 = vadd.xlane.f32.xlu0 %v882_v58  ;;  %v879_v59 = vsel %vm302_vm3, %v5288_v57, 0.0 }
 0x5c3   :  { %880 = vadd.xlane.f32.xlu1 %v879_v59 }
 0x5d4   :  { %976 = vrot.lane.b32.xlu1 %v5724_v9, %s5561_s22 }
 0x5d8   :  { %5107 = vrot.lane.b32.xlu0 %v5732_v10, %s5562_s0  ;;  %5122 = vrot.lane.b32.xlu1 %v5732_v10, %s5563_s23 }
 0x5dc   :  { %978 = vrot.lane.b32.xlu0 %v5722_v8, %s5561_s22 }
 0x64f   :  { %v884_v61 = vpop.xlane.xlu0 %883 }
 0x650   :  { %5289 = vrcp.f32 %v884_v61  ;;  %v881_v62 = vpop.xlane.xlu1 %880 }
 0x651   :  { %5291 = vrcp.f32 %v881_v62 }
 0x653   :  { %v5108_v63 = vpop.permute.xlu0 %5107 }
 0x654   :  { %v5110_v11 = vunpack.i.h.bf16 %v5108_v63  ;;  %v5109_v12 = vunpack.i.l.bf16 %v5108_v63  ;;  %v977_v24 = vpop.permute.xlu1 %976 }
 0x656   :  { %v4852_v13 = vpack.c.bf16 %v5110_v11, %v5109_v12 }
 0x657   :  { %v979_v25 = vpop.permute.xlu0 %978 }
 0x658   :  { %4853 = vmatprep.subr.bf16.mxu0 %v4852_v13  ;;  %v5123_v40 = vpop.permute.xlu1 %5122 }
 0x659   :  { %4855 = vmatpush3.bf16.msra.mxu0 %v4852_v13  ;;  %v5125_v44 = vunpack.i.h.bf16 %v5123_v40  ;;  %v5124_v45 = vunpack.i.l.bf16 %v5123_v40 }
 0x65a   :  { %v5290_v20 = vpop.eup %5289  ;;  %4858 = vmatprep.subr.msk.bf16.mxu0 %vm5743_vm2, %v4856_v14 }
 0x65b   :  { %v5292_v21 = vpop.eup %5291  ;;  %v888_v23 = vmul.f32 %v5290_v20, %v5286_v56  ;;  %v4866_v51 = vpack.c.bf16 %v5125_v44, %v5124_v45 }
 0x65c   :  { %v886_v22 = vmul.f32 %v5292_v21, %v5288_v57 }
 0x65e   :  { %4560 = vmatprep.mubr.msk.f32.mxu0 %vm302_vm3, %v886_v22 }
 0x65f   :  { %4561 = vmatmul.mubr.msk.f32.vlgmr.msra.gmra.mrb[6].mxu0 %vm302_vm3, %v888_v23 }
 0x660   :  { %4567 = vmatprep.mubr.msk.f32.mxu0 %vm214_vm1, %v977_v24 }
 0x662   :  { %4861 = vmatpush3.bf16.xpose.msk.msra.mxu0 %vm5743_vm2, %v4856_v14 }
 0x669   :  { %4568 = vmatmul.mubr.msk.f32.vlgmr.msra.gmra.mrb[8].mxu0 %vm214_vm1, %v979_v25 }
 0x732   :  { %v5836_v28 = vpop.f32.mrb[6].mxu0 }
 0x733   :  { %v5838_v29 = vpop.f32.mrb[7].mxu0 }
 0x73c   :  { %v4569_v30 = vpop.f32.mrb[8].mxu0 }
 0x73d   :  { %v1064_v31 = vadd.f32 %v4569_v30, %v5759_v26  ;;  %v1058_v32 = vpop.f32.mrb[9].mxu0 }
 0x73e   :  { %v1059_v33 = vadd.f32 %v1058_v32, %v5761_v27 }
 0x73f   :  { %v1069_v34 = vmul.f32 1.442695, %v1064_v31 }
 0x740   :  { %v1067_v35 = vmul.f32 1.442695, %v1059_v33 }
 0x741   :  { %5293 = vpow2.f32 %v1069_v34 }
 0x742   :  { %5295 = vpow2.f32 %v1067_v35 }
 0x74b   :  { %v5294_v36 = vpop.eup %5293 }
 0x74c   :  { %v5296_v37 = vpop.eup %5295  ;;  %v1074_v38 = vsel %vm302_vm3, %v5294_v36, 0.0 }
 0x74d   :  { %1075 = vadd.xlane.f32.xlu0 %v1074_v38  ;;  %v1071_v39 = vsel %vm302_vm3, %v5296_v37, 0.0 }
 0x74e   :  { %1072 = vadd.xlane.f32.xlu1 %v1071_v39 }
 0x75f   :  { %1168 = vrot.lane.b32.xlu1 %v5724_v9, %s5564_s25 }
 0x763   :  { %5117 = vrot.lane.b32.xlu0 %v5732_v10, %s5565_s26  ;;  %5132 = vrot.lane.b32.xlu1 %v5732_v10, %s5566_s27 }
 0x767   :  { %1170 = vrot.lane.b32.xlu0 %v5722_v8, %s5564_s25 }
 0x7da   :  { %v1076_v41 = vpop.xlane.xlu0 %1075 }
 0x7db   :  { %5297 = vrcp.f32 %v1076_v41  ;;  %v1073_v42 = vpop.xlane.xlu1 %1072 }
 0x7dc   :  { %5299 = vrcp.f32 %v1073_v42 }
 0x7de   :  { %v5118_v43 = vpop.permute.xlu0 %5117 }
 0x7df   :  { %v5120_v46 = vunpack.i.h.bf16 %v5118_v43  ;;  %v5119_v47 = vunpack.i.l.bf16 %v5118_v43  ;;  %v1169_v56 = vpop.permute.xlu1 %1168 }
 0x7e1   :  { %v4862_v50 = vpack.c.bf16 %v5120_v46, %v5119_v47 }
 0x7e2   :  { %v1171_v57 = vpop.permute.xlu0 %1170 }
 0x7e3   :  { %4863 = vmatprep.subr.bf16.mxu1 %v4862_v50  ;;  %v5133_v20 = vpop.permute.xlu1 %5132 }
 0x7e4   :  { %4865 = vmatpush3.bf16.msra.mxu1 %v4862_v50  ;;  %v5135_v24 = vunpack.i.h.bf16 %v5133_v20  ;;  %v5134_v25 = vunpack.i.l.bf16 %v5133_v20 }
 0x7e5   :  { %v5298_v52 = vpop.eup %5297  ;;  %4868 = vmatprep.subr.msk.bf16.mxu1 %vm5743_vm2, %v4866_v51 }
 0x7e6   :  { %v5300_v53 = vpop.eup %5299  ;;  %v1080_v55 = vmul.f32 %v5298_v52, %v5294_v36  ;;  %v4876_v33 = vpack.c.bf16 %v5135_v24, %v5134_v25 }
 0x7e7   :  { %v1078_v54 = vmul.f32 %v5300_v53, %v5296_v37 }
 0x7e9   :  { %4574 = vmatprep.mubr.msk.f32.mxu1 %vm302_vm3, %v1078_v54 }
 0x7ea   :  { %4575 = vmatmul.mubr.msk.f32.vlgmr.msra.gmra.mrb[10].mxu1 %vm302_vm3, %v1080_v55 }
 0x7eb   :  { %4581 = vmatprep.mubr.msk.f32.mxu1 %vm214_vm1, %v1169_v56 }
 0x7ed   :  { %4871 = vmatpush3.bf16.xpose.msk.msra.mxu1 %vm5743_vm2, %v4866_v51 }
 0x7f4   :  { %4582 = vmatmul.mubr.msk.f32.vlgmr.msra.gmra.mrb[12].mxu1 %vm214_vm1, %v1171_v57 }
 0x8bd   :  { %v5858_v58 = vpop.f32.mrb[10].mxu1 }
 0x8be   :  { %v5860_v59 = vpop.f32.mrb[11].mxu1 }
 0x8c7   :  { %v4583_v60 = vpop.f32.mrb[12].mxu1 }
 0x8c8   :  { %v1256_v61 = vadd.f32 %v4583_v60, %v5759_v26  ;;  %v1250_v62 = vpop.f32.mrb[13].mxu1 }
 0x8c9   :  { %v1251_v63 = vadd.f32 %v1250_v62, %v5761_v27 }
 0x8ca   :  { %v1261_v3 = vmul.f32 1.442695, %v1256_v61 }
 0x8cb   :  { %v1259_v6 = vmul.f32 1.442695, %v1251_v63 }
 0x8cc   :  { %5301 = vpow2.f32 %v1261_v3 }
 0x8cd   :  { %5303 = vpow2.f32 %v1259_v6 }
 0x8d6   :  { %v5302_v11 = vpop.eup %5301 }
 0x8d7   :  { %v5304_v12 = vpop.eup %5303  ;;  %v1266_v13 = vsel %vm302_vm3, %v5302_v11, 0.0 }
 0x8d8   :  { %1267 = vadd.xlane.f32.xlu0 %v1266_v13  ;;  %v1263_v14 = vsel %vm302_vm3, %v5304_v12, 0.0 }
 0x8d9   :  { %1264 = vadd.xlane.f32.xlu1 %v1263_v14 }
 0x8ea   :  { %1360 = vrot.lane.b32.xlu1 %v5724_v9, %s5567_s29 }
 0x8ee   :  { %5127 = vrot.lane.b32.xlu0 %v5732_v10, %s5568_s30  ;;  %5142 = vrot.lane.b32.xlu1 %v5732_v10, %s5569_s7 }
 0x8f2   :  { %1362 = vrot.lane.b32.xlu0 %v5722_v8, %s5567_s29 }
 0x965   :  { %v1268_v21 = vpop.xlane.xlu0 %1267 }
 0x966   :  { %5305 = vrcp.f32 %v1268_v21  ;;  %v1265_v22 = vpop.xlane.xlu1 %1264 }
 0x967   :  { %5307 = vrcp.f32 %v1265_v22 }
 0x969   :  { %v5128_v23 = vpop.permute.xlu0 %5127 }
 0x96a   :  { %v5130_v30 = vunpack.i.h.bf16 %v5128_v23  ;;  %v5129_v31 = vunpack.i.l.bf16 %v5128_v23  ;;  %v1361_v38 = vpop.permute.xlu1 %1360 }
 0x96c   :  { %v4872_v32 = vpack.c.bf16 %v5130_v30, %v5129_v31 }
 0x96d   :  { %v1363_v39 = vpop.permute.xlu0 %1362 }
 0x96e   :  { %4873 = vmatprep.subr.bf16.mxu0 %v4872_v32  ;;  %v5143_v54 = vpop.permute.xlu1 %5142 }
 0x96f   :  { %4875 = vmatpush3.bf16.msra.mxu0 %v4872_v32  ;;  %v5145_v60 = vunpack.i.h.bf16 %v5143_v54  ;;  %v5144_v61 = vunpack.i.l.bf16 %v5143_v54 }
 0x970   :  { %v5306_v34 = vpop.eup %5305  ;;  %4878 = vmatprep.subr.msk.bf16.mxu0 %vm5743_vm2, %v4876_v33 }
 0x971   :  { %v5308_v35 = vpop.eup %5307  ;;  %v1272_v37 = vmul.f32 %v5306_v34, %v5302_v11  ;;  %v4886_v6 = vpack.c.bf16 %v5145_v60, %v5144_v61 }
 0x972   :  { %v1270_v36 = vmul.f32 %v5308_v35, %v5304_v12 }
 0x974   :  { %4588 = vmatprep.mubr.msk.f32.mxu0 %vm302_vm3, %v1270_v36  ;;  %v5151_v36 = vpack.i.bf16 %v5704_v1, %v5702_v0  ;;  %v5156_v0 = vpack.i.bf16 %v5710_v4, %v5706_v2 }
 0x975   :  { %4589 = vmatmul.mubr.msk.f32.vlgmr.msra.gmra.mrb[10].mxu0 %vm302_vm3, %v1272_v37 }
 0x976   :  { %4595 = vmatprep.mubr.msk.f32.mxu0 %vm214_vm1, %v1361_v38 }
 0x978   :  { %4881 = vmatpush3.bf16.xpose.msk.msra.mxu0 %vm5743_vm2, %v4876_v33 }
 0x97f   :  { %4596 = vmatmul.mubr.msk.f32.vlgmr.msra.gmra.mrb[12].mxu0 %vm214_vm1, %v1363_v39 }
 0xa48   :  { %v5880_v40 = vpop.f32.mrb[10].mxu0 }
 0xa49   :  { %v5882_v41 = vpop.f32.mrb[11].mxu0 }
 0xa52   :  { %v4597_v42 = vpop.f32.mrb[12].mxu0 }
 0xa53   :  { %v1448_v43 = vadd.f32 %v4597_v42, %v5759_v26  ;;  %v1442_v44 = vpop.f32.mrb[13].mxu0 }
 0xa54   :  { %v1443_v45 = vadd.f32 %v1442_v44, %v5761_v27 }
 0xa55   :  { %v1453_v46 = vmul.f32 1.442695, %v1448_v43 }
 0xa56   :  { %v1451_v47 = vmul.f32 1.442695, %v1443_v45 }
 0xa57   :  { %5309 = vpow2.f32 %v1453_v46 }
 0xa58   :  { %5311 = vpow2.f32 %v1451_v47 }
 0xa61   :  { %v5310_v50 = vpop.eup %5309 }
 0xa62   :  { %v5312_v51 = vpop.eup %5311  ;;  %v1458_v52 = vsel %vm302_vm3, %v5310_v50, 0.0 }
 0xa63   :  { %1459 = vadd.xlane.f32.xlu0 %v1458_v52  ;;  %v1455_v53 = vsel %vm302_vm3, %v5312_v51, 0.0 }
 0xa64   :  { %1456 = vadd.xlane.f32.xlu1 %v1455_v53 }
 0xa75   :  { %1552 = vrot.lane.b32.xlu1 %v5724_v9, %s5570_s8 }
 0xa79   :  { %5137 = vrot.lane.b32.xlu0 %v5732_v10, %s5571_s11 }
 0xa7d   :  { %1554 = vrot.lane.b32.xlu0 %v5722_v8, %s5570_s8 }
 0xaf0   :  { %v1460_v55 = vpop.xlane.xlu0 %1459 }
 0xaf1   :  { %5313 = vrcp.f32 %v1460_v55  ;;  %v1457_v56 = vpop.xlane.xlu1 %1456 }
 0xaf2   :  { %5315 = vrcp.f32 %v1457_v56 }
 0xaf4   :  { %v5138_v57 = vpop.permute.xlu0 %5137 }
 0xaf5   :  { %v5140_v62 = vunpack.i.h.bf16 %v5138_v57  ;;  %v5139_v63 = vunpack.i.l.bf16 %v5138_v57  ;;  %v1553_v13 = vpop.permute.xlu1 %1552 }
 0xaf7   :  { %v4882_v3 = vpack.c.bf16 %v5140_v62, %v5139_v63 }
 0xaf8   :  { %v1555_v14 = vpop.permute.xlu0 %1554 }
 0xaf9   :  { %4883 = vmatprep.subr.bf16.mxu1 %v4882_v3 }
 0xafa   :  { %4885 = vmatpush3.bf16.msra.mxu1 %v4882_v3 }
 0xafb   :  { %v5314_v9 = vpop.eup %5313  ;;  %4888 = vmatprep.subr.msk.bf16.mxu1 %vm5743_vm2, %v4886_v6 }
 0xafc   :  { %v5316_v11 = vpop.eup %5315  ;;  %v1464_v12 = vmul.f32 %v5314_v9, %v5310_v50 }
 0xafd   :  { %v1462_v8 = vmul.f32 %v5316_v11, %v5312_v51 }
 0xaff   :  { %4602 = vmatprep.mubr.msk.f32.mxu1 %vm302_vm3, %v1462_v8 }
 0xb00   :  { %4603 = vmatmul.mubr.msk.f32.vlgmr.msra.gmra.mrb[14].mxu1 %vm302_vm3, %v1464_v12 }
 0xb01   :  { %4609 = vmatprep.mubr.msk.f32.mxu1 %vm214_vm1, %v1553_v13 }
 0xb03   :  { %4891 = vmatpush3.bf16.xpose.msk.msra.mxu1 %vm5743_vm2, %v4886_v6 }
 0xb0a   :  { %4610 = vmatmul.mubr.msk.f32.vlgmr.msra.gmra.mrb[16].mxu1 %vm214_vm1, %v1555_v14 }
 0xbd3   :  { %v4604_v20 = vpop.f32.mrb[14].mxu1 }
 0xbd4   :  { %v1543_v21 = vpop.f32.mrb[15].mxu1 }
 0xbdd   :  { %v4611_v22 = vpop.f32.mrb[16].mxu1 }
 0xbde   :  { %v1640_v23 = vadd.f32 %v4611_v22, %v5759_v26  ;;  %v1634_v24 = vpop.f32.mrb[17].mxu1 }
 0xbdf   :  { %v1635_v25 = vadd.f32 %v1634_v24, %v5761_v27 }
 0xbe0   :  { %v1645_v30 = vmul.f32 1.442695, %v1640_v23  ;;  %v4250_v23 = vld [vmem:[#allocation10] ss:$0 sm:$0xff] }
 0xbe1   :  { %v1643_v31 = vmul.f32 1.442695, %v1635_v25 }
 0xbe2   :  { %5317 = vpow2.f32 %v1645_v30 }
 0xbe3   :  { %5319 = vpow2.f32 %v1643_v31 }
 0xbec   :  { %v5318_v32 = vpop.eup %5317 }
 0xbed   :  { %v5320_v33 = vpop.eup %5319  ;;  %v1650_v34 = vsel %vm302_vm3, %v5318_v32, 0.0 }
 0xbee   :  { %1651 = vadd.xlane.f32.xlu0 %v1650_v34  ;;  %v1647_v35 = vsel %vm302_vm3, %v5320_v33, 0.0 }
 0xbef   :  { %1648 = vadd.xlane.f32.xlu1 %v1647_v35 }
 0xc00   :  { %5152 = vrot.lane.b32.xlu1 %v5151_v36, %s5546_s21  ;;  %v104_v36 = vld [vmem:[#allocation8 + $0x8] sm:$0xff] }
 0xc04   :  { %5147 = vrot.lane.b32.xlu0 %v5732_v10, %s5572_s12  ;;  %1746 = vrot.lane.b32.xlu1 %v5794_v19, %s5573_s13 }
 0xc08   :  { %1748 = vrot.lane.b32.xlu0 %v5792_v18, %s5573_s13  ;;  %1754 = vrot.lane.b32.xlu1 %v5816_v49, %s5544_s10 }
 0xc0c   :  { %1756 = vrot.lane.b32.xlu0 %v5814_v48, %s5544_s10  ;;  %1762 = vrot.lane.b32.xlu1 %v5838_v29, %s5574_s3 }
 0xc10   :  { %5157 = vrot.lane.b32.xlu0 %v5156_v0, %s5546_s21  ;;  %1764 = vrot.lane.b32.xlu1 %v5836_v28, %s5574_s3  ;;  %v105_v0 = vld [vmem:[#allocation8 + $0x28] sm:$0xff] }
 0xc14   :  { %1770 = vrot.lane.b32.xlu0 %v5860_v59, %s5575_s28  ;;  %1772 = vrot.lane.b32.xlu1 %v5858_v58, %s5575_s28 }
 0xc18   :  { %1778 = vrot.lane.b32.xlu0 %v5882_v41, %s5576_s24  ;;  %1780 = vrot.lane.b32.xlu1 %v5880_v40, %s5576_s24 }
 0xc1c   :  { %1786 = vrot.lane.b32.xlu0 %v1543_v21, %s5577_s15  ;;  %1788 = vrot.lane.b32.xlu1 %v4604_v20, %s5577_s15 }
 0xc7b   :  { %v1652_v1 = vpop.xlane.xlu0 %1651 }
 0xc7c   :  { %5321 = vrcp.f32 %v1652_v1  ;;  %v1649_v2 = vpop.xlane.xlu1 %1648  ;;  %v5960_v1 = vpack.i.bf16 %v105_v0, %v104_v36 }
 0xc7d   :  { %5323 = vrcp.f32 %v1649_v2 }
 0xc7f   :  { %v5148_v4 = vpop.permute.xlu0 %5147 }
 0xc80   :  { %v5150_v10 = vunpack.i.h.bf16 %v5148_v4  ;;  %v5149_v18 = vunpack.i.l.bf16 %v5148_v4  ;;  %v5153_v19 = vpop.permute.xlu1 %5152 }
 0xc81   :  { %v5155_v48 = vunpack.i.h.bf16 %v5153_v19  ;;  %v5154_v49 = vunpack.i.l.bf16 %v5153_v19 }
 0xc82   :  { %v4892_v28 = vpack.c.bf16 %v5150_v10, %v5149_v18 }
 0xc83   :  { %v4896_v29 = vpack.c.bf16 %v5155_v48, %v5154_v49  ;;  %v1749_v58 = vpop.permute.xlu0 %1748 }
 0xc84   :  { %v1801_v59 = vsel %vm214_vm1, %v5788_v15, %v1749_v58  ;;  %4893 = vmatprep.subr.bf16.mxu0 %v4892_v28  ;;  %v1747_v50 = vpop.permute.xlu1 %1746  ;;  %v107_v58 = vld [vmem:[#allocation8 + $0x68] sm:$0xff] }
 0xc85   :  { %4895 = vmatpush3.bf16.msra.mxu0 %v4892_v28  ;;  %v1800_v60 = vsel %vm214_vm1, %v5790_v17, %v1747_v50 }
 0xc86   :  { %v5322_v37 = vpop.eup %5321  ;;  %4897 = vmatprep.subr.bf16.mxu0 %v4896_v29 }
 0xc87   :  { %v5324_v38 = vpop.eup %5323  ;;  %v1757_v39 = vpop.permute.xlu0 %1756  ;;  %v1656_v42 = vmul.f32 %v5322_v37, %v5318_v32 }
 0xc88   :  { %v1804_v40 = vsel %vm1802_vm4, %v1801_v59, %v1757_v39  ;;  %v1654_v41 = vmul.f32 %v5324_v38, %v5320_v33  ;;  %v1755_v51 = vpop.permute.xlu1 %1754 }
 0xc89   :  { %v1803_v62 = vsel %vm1802_vm4, %v1800_v60, %v1755_v51 }
 0xc8a   :  { %4616 = vmatprep.mubr.msk.f32.mxu0 %vm302_vm3, %v1654_v41  ;;  %v94_v41 = vld [vmem:[#allocation5] sm:$0xff] }
 0xc8b   :  { %v5158_v43 = vpop.permute.xlu0 %5157  ;;  %4617 = vmatmul.mubr.msk.f32.vlgmr.msra.gmra.mrb[14].mxu0 %vm302_vm3, %v1656_v42  ;;  %v4904_v42 = vpack.c.bf16 %v105_v0, %v104_v36 }
 0xc8c   :  { %v5160_v44 = vunpack.i.h.bf16 %v5158_v43  ;;  %v5159_v45 = vunpack.i.l.bf16 %v5158_v43  ;;  %4899 = vmatpush3.bf16.msra.mxu0 %v4896_v29  ;;  %v1763_v52 = vpop.permute.xlu1 %1762  ;;  %v106_v29 = vld [vmem:[#allocation8 + $0x48] sm:$0xff] }
 0xc8d   :  { %v1806_v3 = vsel %vm1805_vm5, %v1803_v62, %v1763_v52  ;;  %v5966_v37 = vpack.i.bf16 %v107_v58, %v106_v29  ;;  %v4908_v43 = vpack.c.bf16 %v107_v58, %v106_v29  ;;  %4905 = vmatprep.subr.bf16.mxu1 %v4904_v42 }
 0xc8e   :  { %v4900_v15 = vpack.c.bf16 %v5160_v44, %v5159_v45  ;;  %4907 = vmatpush3.bf16.msra.mxu1 %v4904_v42 }
 0xc8f   :  { %v1771_v55 = vpop.permute.xlu0 %1770  ;;  %4909 = vmatprep.subr.bf16.mxu1 %v4908_v43 }
 0xc90   :  { %4901 = vmatprep.subr.bf16.mxu0 %v4900_v15  ;;  %v1765_v53 = vpop.permute.xlu1 %1764  ;;  %v1808_v6 = vsel %vm302_vm3, %v1806_v3, %v1771_v55  ;;  %v95_v55 = vld [vmem:[#allocation5 + $0x8] sm:$0xff] }
 0xc91   :  { %4903 = vmatpush3.bf16.msra.mxu0 %v4900_v15  ;;  %v1807_v9 = vsel %vm1805_vm5, %v1804_v40, %v1765_v53 }
 0xc92   :  { %4911 = vmatpush3.bf16.msra.mxu1 %v4908_v43 }
 0xc93   :  { %v1779_v57 = vpop.permute.xlu0 %1778 }
 0xc94   :  { %v1773_v54 = vpop.permute.xlu1 %1772  ;;  %v1811_v11 = vsel %vm1810_vm6, %v1808_v6, %v1779_v57  ;;  %v4253_v57 = vld [vmem:[#allocation10 + $0x1] ss:$0 sm:$0xff] }
 0xc95   :  { %v1809_v8 = vsel %vm302_vm3, %v1807_v9, %v1773_v54 }
 0xc97   :  { %v1787_v63 = vpop.permute.xlu0 %1786 }
 0xc98   :  { %v1781_v56 = vpop.permute.xlu1 %1780  ;;  %v1814_v17 = vsel %vm1813_vm7, %v1811_v11, %v1787_v63  ;;  %v4254_v63 = vld [vmem:[#allocation10 + $0x2] ss:$0 sm:$0xff]  ;;  %v96_v11 = vld [vmem:[%s6255_s2] sm:$0xff] }
 0xc99   :  { %v1812_v13 = vsel %vm1810_vm6, %v1809_v8, %v1781_v56 }
 0xc9c   :  { %v1789_v61 = vpop.permute.xlu1 %1788 }
 0xc9d   :  { %v1815_v20 = vsel %vm1813_vm7, %v1812_v13, %v1789_v61 }
 0xd5e   :  { %v4618_v46 = vpop.f32.mrb[14].mxu0 }
 0xd5f   :  { %1796 = vrot.lane.b32.xlu1 %v4618_v46, %s5578_s17  ;;  %v1735_v47 = vpop.f32.mrb[15].mxu0 }
 0xd60   :  { %1794 = vrot.lane.b32.xlu0 %v1735_v47, %s5578_s17 }
 0xdd1   :  { %v1797_v12 = vpop.permute.xlu1 %1796 }
 0xdd2   :  { %v1795_v14 = vpop.permute.xlu0 %1794  ;;  %v1818_v22 = vsel %vm1816_vm8, %v1815_v20, %v1797_v12 }
 0xdd3   :  { %v1817_v21 = vsel %vm1816_vm8, %v1814_v17, %v1795_v14 }
 0xdd4   :  { %4627 = vmatprep.mubr.msk.f32.mxu0 %vm126_vm0, %v1817_v21 }
 0xdd5   :  { %4628 = vmatmul.mubr.msk.f32.vlgmr.msra.gmra.mrb[16].mxu0 %vm126_vm0, %v1818_v22 }
 0xdd6   :  { %4649 = vmatprep.mubr.msk.f32.mxu0 %vm126_vm0, %v94_v41 }
 0xea8   :  { %v4629_v24 = vpop.f32.mrb[16].mxu0 }
 0xea9   :  { %v1917_v25 = vadd.f32 %v4629_v24, %v4250_v23  ;;  %v1911_v30 = vpop.f32.mrb[17].mxu0 }
 0xeaa   :  { %v1912_v31 = vadd.f32 %v4250_v23, %v1911_v30 }
 0xeab   :  { %v1921_v32 = vadd.f32 %v1917_v25, %v5718_v7 }
 0xeac   :  { %v1920_v33 = vadd.f32 %v1912_v31, %v5712_v5 }
 0xead   :  { %v1925_v34 = vsel %vm126_vm0, %v1921_v32, 0.0 }
 0xeae   :  { %1926 = vadd.xlane.f32.xlu1 %v1925_v34  ;;  %v1922_v35 = vsel %vm126_vm0, %v1920_v33, 0.0 }
 0xeaf   :  { %1923 = vadd.xlane.f32.xlu0 %v1922_v35 }
 0xebf   :  { %5162 = vrot.lane.b32.xlu1 %v5960_v1, %s5551_s4 }
 0xec3   :  { %5172 = vrot.lane.b32.xlu1 %v5960_v1, %s5553_s14 }
 0xec7   :  { %5177 = vrot.lane.b32.xlu1 %v5966_v37, %s5553_s14 }
 0xecb   :  { %2236 = vrot.lane.b32.xlu1 %v5759_v26, %s5561_s22 }
 0xf3b   :  { %v1927_v2 = vpop.xlane.xlu1 %1926 }
 0xf3c   :  { %v1930_v4 = vmul.f32 0.03125, %v1927_v2  ;;  %v1924_v10 = vpop.xlane.xlu0 %1923 }
 0xf3d   :  { %v1929_v18 = vmul.f32 0.03125, %v1924_v10 }
 0xf3e   :  { %v1932_v7 = vsub.f32 %v1921_v32, %v1930_v4  ;;  %v97_v32 = vld [vmem:[%s6255_s2 + $0x8] sm:$0xff]  ;;  %s5579_s2 = smov [#allocation11]  }
 0xf3f   :  { %v1931_v19 = vsub.f32 %v1920_v33, %v1929_v18  ;;  %v5163_v59 = vpop.permute.xlu1 %5162 }
 0xf40   :  { %v1934_v5 = vmul.f32 %v1932_v7, %v1932_v7  ;;  %v5165_v38 = vunpack.i.h.bf16 %v5163_v59  ;;  %v5164_v39 = vunpack.i.l.bf16 %v5163_v59 }
 0xf41   :  { %v1933_v49 = vmul.f32 %v1931_v19, %v1931_v19 }
 0xf42   :  { %v1938_v48 = vsel %vm126_vm0, %v1934_v5, 0.0  ;;  %v4912_v40 = vpack.c.bf16 %v5165_v38, %v5164_v39 }
 0xf43   :  { %1939 = vadd.xlane.f32.xlu0 %v1938_v48  ;;  %v1935_v28 = vsel %vm126_vm0, %v1933_v49, 0.0  ;;  %v5173_v17 = vpop.permute.xlu1 %5172 }
 0xf44   :  { %4913 = vmatprep.subr.bf16.mxu0 %v4912_v40  ;;  %v5175_v14 = vunpack.i.h.bf16 %v5173_v17  ;;  %v5174_v20 = vunpack.i.l.bf16 %v5173_v17 }
 0xf45   :  { %4915 = vmatpush3.bf16.msra.mxu0 %v4912_v40 }
 0xf46   :  { %v4920_v22 = vpack.c.bf16 %v5175_v14, %v5174_v20 }
 0xf47   :  { %1936 = vadd.xlane.f32.xlu0 %v1935_v28  ;;  %v5178_v23 = vpop.permute.xlu1 %5177 }
 0xf48   :  { %v5180_v24 = vunpack.i.h.bf16 %v5178_v23  ;;  %v5179_v25 = vunpack.i.l.bf16 %v5178_v23  ;;  %4921 = vmatprep.subr.bf16.mxu1 %v4920_v22 }
 0xf4a   :  { %v4924_v26 = vpack.c.bf16 %v5180_v24, %v5179_v25 }
 0xf4b   :  { %v6004_v33 = vpop.permute.xlu1 %2236 }
 0xf5d   :  { %5167 = vrot.lane.b32.xlu0 %v5966_v37, %s5551_s4 }
 0xf61   :  { %2234 = vrot.lane.b32.xlu0 %v5761_v27, %s5561_s22 }
 0xfd0   :  { %v1940_v44 = vpop.xlane.xlu0 %1939 }
 0xfd1   :  { %v1942_v45 = vmul.f32 0.03125, %v1940_v44 }
 0xfd3   :  { %v1944_v15 = vadd.f32 1e-05, %v1942_v45 }
 0xfd4   :  { %v1937_v46 = vpop.xlane.xlu0 %1936 }
 0xfd5   :  { %5325 = vrsqrt.f32 %v1944_v15  ;;  %v1941_v47 = vmul.f32 0.03125, %v1937_v46 }
 0xfd7   :  { %v1943_v50 = vadd.f32 1e-05, %v1941_v47 }
 0xfd8   :  { %v5168_v51 = vpop.permute.xlu0 %5167 }
 0xfd9   :  { %5327 = vrsqrt.f32 %v1943_v50  ;;  %v5170_v52 = vunpack.i.h.bf16 %v5168_v51  ;;  %v5169_v53 = vunpack.i.l.bf16 %v5168_v51 }
 0xfdb   :  { %v4916_v54 = vpack.c.bf16 %v5170_v52, %v5169_v53 }
 0xfdc   :  { %v6006_v34 = vpop.permute.xlu0 %2234 }
 0xfdd   :  { %4917 = vmatprep.subr.bf16.mxu0 %v4916_v54 }
 0xfde   :  { %4919 = vmatpush3.bf16.msra.mxu0 %v4916_v54 }
 0xfdf   :  { %v5326_v27 = vpop.eup %5325 }
 0xfe0   :  { %v1948_v56 = vmul.f32 %v5326_v27, %v1932_v7 }
 0xfe1   :  { %4650 = vmatmul.mubr.msk.f32.vlgmr.msra.gmra.mrb[18].mxu0 %vm126_vm0, %v95_v55 }
 0xfe2   :  { %v1954_v62 = vmul.f32 %v4253_v57, %v1948_v56 }
 0xfe3   :  { %v5328_v60 = vpop.eup %5327 }
 0xfe4   :  { %v1947_v61 = vmul.f32 %v5328_v60, %v1931_v19  ;;  %v1960_v9 = vadd.f32 %v4254_v63, %v1954_v62 }
 0xfe6   :  { %v1953_v3 = vmul.f32 %v4253_v57, %v1947_v61 }
 0xfe8   :  { %v1959_v6 = vadd.f32 %v4254_v63, %v1953_v3 }
 0xfea   :  { %4638 = vmatprep.mubr.msk.f32.mxu1 %vm126_vm0, %v1959_v6 }
 0xfeb   :  { %4639 = vmatmul.mubr.msk.f32.vlgmr.msra.gmra.mrb[18].mxu1 %vm126_vm0, %v1960_v9 }
 0xfec   :  { %4660 = vmatprep.mubr.msk.f32.mxu1 %vm126_vm0, %v96_v11  ;;  %4923 = vmatpush3.bf16.msra.mxu1 %v4920_v22 }
 0xfed   :  { %4925 = vmatprep.subr.bf16.mxu1 %v4924_v26 }
 0xff0   :  { %4927 = vmatpush3.bf16.msra.mxu1 %v4924_v26 }
 0xff3   :  { %4661 = vmatmul.mubr.msk.f32.vlgmr.msra.gmra.mrb[20].mxu1 %vm126_vm0, %v97_v32 }
0x10b4   :  { %v4651_v8 = vpop.f32.mrb[18].mxu0 }
0x10b5   :  { %v2130_v12 = vpop.f32.mrb[19].mxu0 }
0x10b6   :  { %v4928_v13 = vpack.c.bf16 %v4651_v8, %v2130_v12  ;;  %v5986_v21 = vpack.i.bf16 %v4651_v8, %v2130_v12 }
0x10b8   :  { %4930 = vmatprep.subr.msk.bf16.mxu0 %vm5743_vm2, %v4928_v13 }
0x10b9   :  { %4933 = vmatpush3.bf16.xpose.msk.msra.mxu0 %vm5743_vm2, %v4928_v13 }
0x10be   :  { %v5992_v30 = vpop.f32.mrb[18].mxu1 }
0x10bf   :  { %v5994_v31 = vpop.f32.mrb[19].mxu1 }
0x10c0   :  { %4667 = vmatprep.mubr.msk.f32.mxu0 %vm214_vm1, %v5994_v31 }
0x10c1   :  { %4668 = vmatmul.mubr.msk.f32.vlgmr.msra.gmra.mrb[20].mxu0 %vm214_vm1, %v5992_v30 }
0x10c6   :  { %v4662_v2 = vpop.f32.mrb[20].mxu1 }
0x10c7   :  { %v2223_v49 = vpop.f32.mrb[21].mxu1 }
0x10c8   :  { %v4934_v28 = vpack.c.bf16 %v4662_v2, %v2223_v49  ;;  %v6014_v29 = vpack.i.bf16 %v4662_v2, %v2223_v49 }
0x10ca   :  { %4935 = vmatprep.subr.bf16.mxu1 %v4934_v28 }
0x10cb   :  { %4937 = vmatpush3.bf16.msra.mxu1 %v4934_v28 }
0x1194   :  { %v4669_v35 = vpop.f32.mrb[20].mxu0 }
0x1195   :  { %v2324_v36 = vadd.f32 %v4669_v35, %v6004_v33  ;;  %v2318_v0 = vpop.f32.mrb[21].mxu0 }
0x1196   :  { %v2319_v4 = vadd.f32 %v2318_v0, %v6006_v34 }
0x1197   :  { %v2329_v10 = vmul.f32 1.442695, %v2324_v36 }
0x1198   :  { %v2327_v18 = vmul.f32 1.442695, %v2319_v4 }
0x1199   :  { %5329 = vpow2.f32 %v2329_v10 }
0x119a   :  { %5331 = vpow2.f32 %v2327_v18 }
0x11a3   :  { %v5330_v7 = vpop.eup %5329 }
0x11a4   :  { %v5332_v19 = vpop.eup %5331  ;;  %v2334_v5 = vsel %vm302_vm3, %v5330_v7, 0.0 }
0x11a5   :  { %2335 = vadd.xlane.f32.xlu1 %v2334_v5  ;;  %v2331_v48 = vsel %vm302_vm3, %v5332_v19, 0.0 }
0x11a6   :  { %2332 = vadd.xlane.f32.xlu0 %v2331_v48 }
0x11b6   :  { %2422 = vrot.lane.b32.xlu1 %v5994_v31, %s5550_s5 }
0x11ba   :  { %5192 = vrot.lane.b32.xlu1 %v5986_v21, %s5555_s16 }
0x11bc   :  { %5182 = vrot.lane.b32.xlu0 %v5986_v21, %s5550_s5 }
0x11c0   :  { %2424 = vrot.lane.b32.xlu0 %v5992_v30, %s5550_s5 }
0x1232   :  { %v2336_v58 = vpop.xlane.xlu1 %2335 }
0x1233   :  { %5333 = vrcp.f32 %v2336_v58  ;;  %v2333_v59 = vpop.xlane.xlu0 %2332 }
0x1234   :  { %5335 = vrcp.f32 %v2333_v59 }
0x1236   :  { %v2423_v15 = vpop.permute.xlu1 %2422 }
0x1237   :  { %v5183_v38 = vpop.permute.xlu0 %5182 }
0x1238   :  { %v5185_v39 = vunpack.i.h.bf16 %v5183_v38  ;;  %v5184_v40 = vunpack.i.l.bf16 %v5183_v38 }
0x123a   :  { %v4938_v41 = vpack.c.bf16 %v5185_v39, %v5184_v40  ;;  %v5193_v62 = vpop.permute.xlu1 %5192 }
0x123b   :  { %v2425_v46 = vpop.permute.xlu0 %2424  ;;  %v5195_v9 = vunpack.i.h.bf16 %v5193_v62  ;;  %v5194_v11 = vunpack.i.l.bf16 %v5193_v62 }
0x123c   :  { %4940 = vmatprep.subr.msk.bf16.mxu1 %vm5743_vm2, %v4938_v41 }
0x123d   :  { %v5334_v42 = vpop.eup %5333  ;;  %v4948_v13 = vpack.c.bf16 %v5195_v9, %v5194_v11 }
0x123e   :  { %v5336_v43 = vpop.eup %5335  ;;  %v2340_v45 = vmul.f32 %v5334_v42, %v5330_v7 }
0x123f   :  { %v2338_v44 = vmul.f32 %v5336_v43, %v5332_v19 }
0x1241   :  { %4674 = vmatprep.mubr.msk.f32.mxu1 %vm302_vm3, %v2338_v44 }
0x1242   :  { %4675 = vmatmul.mubr.msk.f32.vlgmr.msra.gmra.mrb[22].mxu1 %vm302_vm3, %v2340_v45 }
0x1243   :  { %4943 = vmatpush3.bf16.xpose.msk.msra.mxu1 %vm5743_vm2, %v4938_v41  ;;  %4681 = vmatprep.mubr.msk.f32.mxu1 %vm214_vm1, %v2423_v15 }
0x124a   :  { %4682 = vmatmul.mubr.msk.f32.vlgmr.msra.gmra.mrb[24].mxu1 %vm214_vm1, %v2425_v46 }
0x1315   :  { %v6030_v47 = vpop.f32.mrb[22].mxu1 }
0x1316   :  { %v6032_v50 = vpop.f32.mrb[23].mxu1 }
0x131d   :  { %v4683_v51 = vpop.f32.mrb[24].mxu1 }
0x131e   :  { %v2510_v52 = vadd.f32 %v4683_v51, %v6004_v33  ;;  %v2504_v53 = vpop.f32.mrb[25].mxu1 }
0x131f   :  { %v2505_v54 = vadd.f32 %v2504_v53, %v6006_v34 }
0x1320   :  { %v2515_v55 = vmul.f32 1.442695, %v2510_v52 }
0x1321   :  { %v2513_v27 = vmul.f32 1.442695, %v2505_v54 }
0x1322   :  { %5337 = vpow2.f32 %v2515_v55 }
0x1323   :  { %5339 = vpow2.f32 %v2513_v27 }
0x132c   :  { %v5338_v56 = vpop.eup %5337 }
0x132d   :  { %v5340_v57 = vpop.eup %5339  ;;  %v2520_v60 = vsel %vm302_vm3, %v5338_v56, 0.0 }
0x132e   :  { %2521 = vadd.xlane.f32.xlu0 %v2520_v60  ;;  %v2517_v61 = vsel %vm302_vm3, %v5340_v57, 0.0 }
0x132f   :  { %2518 = vadd.xlane.f32.xlu1 %v2517_v61 }
0x1340   :  { %2616 = vrot.lane.b32.xlu1 %v5994_v31, %s5555_s16 }
0x1344   :  { %5187 = vrot.lane.b32.xlu0 %v6014_v29, %s5550_s5  ;;  %5202 = vrot.lane.b32.xlu1 %v5986_v21, %s5558_s19 }
0x1348   :  { %2618 = vrot.lane.b32.xlu0 %v5992_v30, %s5555_s16 }
0x13bb   :  { %v2522_v63 = vpop.xlane.xlu0 %2521 }
0x13bc   :  { %5341 = vrcp.f32 %v2522_v63  ;;  %v2519_v3 = vpop.xlane.xlu1 %2518 }
0x13bd   :  { %5343 = vrcp.f32 %v2519_v3 }
0x13bf   :  { %v5188_v6 = vpop.permute.xlu0 %5187 }
0x13c0   :  { %v5190_v8 = vunpack.i.h.bf16 %v5188_v6  ;;  %v5189_v12 = vunpack.i.l.bf16 %v5188_v6  ;;  %v2617_v24 = vpop.permute.xlu1 %2616 }
0x13c2   :  { %v4944_v17 = vpack.c.bf16 %v5190_v8, %v5189_v12 }
0x13c3   :  { %v2619_v25 = vpop.permute.xlu0 %2618 }
0x13c4   :  { %4945 = vmatprep.subr.bf16.mxu0 %v4944_v17  ;;  %v5203_v48 = vpop.permute.xlu1 %5202 }
0x13c5   :  { %4947 = vmatpush3.bf16.msra.mxu0 %v4944_v17  ;;  %v5205_v59 = vunpack.i.h.bf16 %v5203_v48  ;;  %v5204_v38 = vunpack.i.l.bf16 %v5203_v48 }
0x13c6   :  { %v5342_v14 = vpop.eup %5341  ;;  %4950 = vmatprep.subr.msk.bf16.mxu0 %vm5743_vm2, %v4948_v13 }
0x13c7   :  { %v5344_v20 = vpop.eup %5343  ;;  %v2526_v23 = vmul.f32 %v5342_v14, %v5338_v56  ;;  %v4958_v42 = vpack.c.bf16 %v5205_v59, %v5204_v38 }
0x13c8   :  { %v2524_v22 = vmul.f32 %v5344_v20, %v5340_v57 }
0x13ca   :  { %4688 = vmatprep.mubr.msk.f32.mxu0 %vm302_vm3, %v2524_v22 }
0x13cb   :  { %4689 = vmatmul.mubr.msk.f32.vlgmr.msra.gmra.mrb[22].mxu0 %vm302_vm3, %v2526_v23 }
0x13cc   :  { %4695 = vmatprep.mubr.msk.f32.mxu0 %vm214_vm1, %v2617_v24 }
0x13ce   :  { %4953 = vmatpush3.bf16.xpose.msk.msra.mxu0 %vm5743_vm2, %v4948_v13 }
0x13d5   :  { %4696 = vmatmul.mubr.msk.f32.vlgmr.msra.gmra.mrb[24].mxu0 %vm214_vm1, %v2619_v25 }
0x149e   :  { %v6054_v26 = vpop.f32.mrb[22].mxu0 }
0x149f   :  { %v6056_v32 = vpop.f32.mrb[23].mxu0 }
0x14a8   :  { %v4697_v35 = vpop.f32.mrb[24].mxu0 }
0x14a9   :  { %v2704_v36 = vadd.f32 %v4697_v35, %v6004_v33  ;;  %v2698_v0 = vpop.f32.mrb[25].mxu0 }
0x14aa   :  { %v2699_v2 = vadd.f32 %v2698_v0, %v6006_v34 }
0x14ab   :  { %v2709_v4 = vmul.f32 1.442695, %v2704_v36 }
0x14ac   :  { %v2707_v10 = vmul.f32 1.442695, %v2699_v2 }
0x14ad   :  { %5345 = vpow2.f32 %v2709_v4 }
0x14ae   :  { %5347 = vpow2.f32 %v2707_v10 }
0x14b7   :  { %v5346_v18 = vpop.eup %5345 }
0x14b8   :  { %v5348_v7 = vpop.eup %5347  ;;  %v2714_v19 = vsel %vm302_vm3, %v5346_v18, 0.0 }
0x14b9   :  { %2715 = vadd.xlane.f32.xlu0 %v2714_v19  ;;  %v2711_v5 = vsel %vm302_vm3, %v5348_v7, 0.0 }
0x14ba   :  { %2712 = vadd.xlane.f32.xlu1 %v2711_v5 }
0x14cb   :  { %2808 = vrot.lane.b32.xlu1 %v5994_v31, %s5558_s19 }
0x14cf   :  { %5197 = vrot.lane.b32.xlu0 %v6014_v29, %s5555_s16  ;;  %5212 = vrot.lane.b32.xlu1 %v5986_v21, %s5561_s22 }
0x14d3   :  { %2810 = vrot.lane.b32.xlu0 %v5992_v30, %s5558_s19 }
0x1546   :  { %v2716_v49 = vpop.xlane.xlu0 %2715 }
0x1547   :  { %5349 = vrcp.f32 %v2716_v49  ;;  %v2713_v28 = vpop.xlane.xlu1 %2712 }
0x1548   :  { %5351 = vrcp.f32 %v2713_v28 }
0x154a   :  { %v5198_v58 = vpop.permute.xlu0 %5197 }
0x154b   :  { %v5200_v39 = vunpack.i.h.bf16 %v5198_v58  ;;  %v5199_v40 = vunpack.i.l.bf16 %v5198_v58  ;;  %v2809_v46 = vpop.permute.xlu1 %2808 }
0x154d   :  { %v4954_v41 = vpack.c.bf16 %v5200_v39, %v5199_v40 }
0x154e   :  { %v2811_v51 = vpop.permute.xlu0 %2810 }
0x154f   :  { %4955 = vmatprep.subr.bf16.mxu1 %v4954_v41  ;;  %v5213_v6 = vpop.permute.xlu1 %5212 }
0x1550   :  { %4957 = vmatpush3.bf16.msra.mxu1 %v4954_v41  ;;  %v5215_v12 = vunpack.i.h.bf16 %v5213_v6  ;;  %v5214_v17 = vunpack.i.l.bf16 %v5213_v6 }
0x1551   :  { %v5350_v43 = vpop.eup %5349  ;;  %4960 = vmatprep.subr.msk.bf16.mxu1 %vm5743_vm2, %v4958_v42 }
0x1552   :  { %v5352_v44 = vpop.eup %5351  ;;  %v2720_v15 = vmul.f32 %v5350_v43, %v5346_v18  ;;  %v4968_v22 = vpack.c.bf16 %v5215_v12, %v5214_v17 }
0x1553   :  { %v2718_v45 = vmul.f32 %v5352_v44, %v5348_v7 }
0x1555   :  { %4702 = vmatprep.mubr.msk.f32.mxu1 %vm302_vm3, %v2718_v45 }
0x1556   :  { %4703 = vmatmul.mubr.msk.f32.vlgmr.msra.gmra.mrb[26].mxu1 %vm302_vm3, %v2720_v15 }
0x1557   :  { %4709 = vmatprep.mubr.msk.f32.mxu1 %vm214_vm1, %v2809_v46 }
0x1559   :  { %4963 = vmatpush3.bf16.xpose.msk.msra.mxu1 %vm5743_vm2, %v4958_v42 }
0x1560   :  { %4710 = vmatmul.mubr.msk.f32.vlgmr.msra.gmra.mrb[28].mxu1 %vm214_vm1, %v2811_v51 }
0x1629   :  { %v6078_v52 = vpop.f32.mrb[26].mxu1 }
0x162a   :  { %v6080_v53 = vpop.f32.mrb[27].mxu1 }
0x1633   :  { %v4711_v54 = vpop.f32.mrb[28].mxu1 }
0x1634   :  { %v2896_v55 = vadd.f32 %v4711_v54, %v6004_v33  ;;  %v2890_v27 = vpop.f32.mrb[29].mxu1 }
0x1635   :  { %v2891_v56 = vadd.f32 %v2890_v27, %v6006_v34 }
0x1636   :  { %v2901_v57 = vmul.f32 1.442695, %v2896_v55 }
0x1637   :  { %v2899_v60 = vmul.f32 1.442695, %v2891_v56 }
0x1638   :  { %5353 = vpow2.f32 %v2901_v57 }
0x1639   :  { %5355 = vpow2.f32 %v2899_v60 }
0x1642   :  { %v5354_v61 = vpop.eup %5353 }
0x1643   :  { %v5356_v62 = vpop.eup %5355  ;;  %v2906_v63 = vsel %vm302_vm3, %v5354_v61, 0.0 }
0x1644   :  { %2907 = vadd.xlane.f32.xlu0 %v2906_v63  ;;  %v2903_v3 = vsel %vm302_vm3, %v5356_v62, 0.0 }
0x1645   :  { %2904 = vadd.xlane.f32.xlu1 %v2903_v3 }
0x1656   :  { %3000 = vrot.lane.b32.xlu1 %v5994_v31, %s5561_s22 }
0x165a   :  { %5207 = vrot.lane.b32.xlu0 %v6014_v29, %s5558_s19  ;;  %5222 = vrot.lane.b32.xlu1 %v5986_v21, %s5564_s25 }
0x165e   :  { %3002 = vrot.lane.b32.xlu0 %v5992_v30, %s5561_s22 }
0x16d1   :  { %v2908_v9 = vpop.xlane.xlu0 %2907 }
0x16d2   :  { %5357 = vrcp.f32 %v2908_v9  ;;  %v2905_v11 = vpop.xlane.xlu1 %2904 }
0x16d3   :  { %5359 = vrcp.f32 %v2905_v11 }
0x16d5   :  { %v5208_v8 = vpop.permute.xlu0 %5207 }
0x16d6   :  { %v5210_v13 = vunpack.i.h.bf16 %v5208_v8  ;;  %v5209_v14 = vunpack.i.l.bf16 %v5208_v8  ;;  %v3001_v36 = vpop.permute.xlu1 %3000 }
0x16d8   :  { %v4964_v20 = vpack.c.bf16 %v5210_v13, %v5209_v14 }
0x16d9   :  { %v3003_v0 = vpop.permute.xlu0 %3002 }
0x16da   :  { %4965 = vmatprep.subr.bf16.mxu0 %v4964_v20  ;;  %v5223_v38 = vpop.permute.xlu1 %5222 }
0x16db   :  { %4967 = vmatpush3.bf16.msra.mxu0 %v4964_v20  ;;  %v5225_v42 = vunpack.i.h.bf16 %v5223_v38  ;;  %v5224_v43 = vunpack.i.l.bf16 %v5223_v38 }
0x16dc   :  { %v5358_v23 = vpop.eup %5357  ;;  %4970 = vmatprep.subr.msk.bf16.mxu0 %vm5743_vm2, %v4968_v22 }
0x16dd   :  { %v5360_v24 = vpop.eup %5359  ;;  %v2912_v35 = vmul.f32 %v5358_v23, %v5354_v61  ;;  %v4978_v46 = vpack.c.bf16 %v5225_v42, %v5224_v43 }
0x16de   :  { %v2910_v25 = vmul.f32 %v5360_v24, %v5356_v62 }
0x16e0   :  { %4716 = vmatprep.mubr.msk.f32.mxu0 %vm302_vm3, %v2910_v25 }
0x16e1   :  { %4717 = vmatmul.mubr.msk.f32.vlgmr.msra.gmra.mrb[26].mxu0 %vm302_vm3, %v2912_v35 }
0x16e2   :  { %4723 = vmatprep.mubr.msk.f32.mxu0 %vm214_vm1, %v3001_v36 }
0x16e4   :  { %4973 = vmatpush3.bf16.xpose.msk.msra.mxu0 %vm5743_vm2, %v4968_v22 }
0x16eb   :  { %4724 = vmatmul.mubr.msk.f32.vlgmr.msra.gmra.mrb[28].mxu0 %vm214_vm1, %v3003_v0 }
0x17b4   :  { %v6102_v2 = vpop.f32.mrb[26].mxu0 }
0x17b5   :  { %v6104_v4 = vpop.f32.mrb[27].mxu0 }
0x17be   :  { %v4725_v10 = vpop.f32.mrb[28].mxu0 }
0x17bf   :  { %v3088_v18 = vadd.f32 %v4725_v10, %v6004_v33  ;;  %v3082_v7 = vpop.f32.mrb[29].mxu0 }
0x17c0   :  { %v3083_v19 = vadd.f32 %v3082_v7, %v6006_v34 }
0x17c1   :  { %v3093_v5 = vmul.f32 1.442695, %v3088_v18 }
0x17c2   :  { %v3091_v48 = vmul.f32 1.442695, %v3083_v19 }
0x17c3   :  { %5361 = vpow2.f32 %v3093_v5 }
0x17c4   :  { %5363 = vpow2.f32 %v3091_v48 }
0x17cd   :  { %v5362_v49 = vpop.eup %5361 }
0x17ce   :  { %v5364_v28 = vpop.eup %5363  ;;  %v3098_v58 = vsel %vm302_vm3, %v5362_v49, 0.0 }
0x17cf   :  { %3099 = vadd.xlane.f32.xlu0 %v3098_v58  ;;  %v3095_v59 = vsel %vm302_vm3, %v5364_v28, 0.0 }
0x17d0   :  { %3096 = vadd.xlane.f32.xlu1 %v3095_v59 }
0x17e1   :  { %3192 = vrot.lane.b32.xlu1 %v5994_v31, %s5564_s25 }
0x17e5   :  { %5217 = vrot.lane.b32.xlu0 %v6014_v29, %s5561_s22  ;;  %5232 = vrot.lane.b32.xlu1 %v5986_v21, %s5567_s29 }
0x17e9   :  { %3194 = vrot.lane.b32.xlu0 %v5992_v30, %s5564_s25 }
0x185c   :  { %v3100_v39 = vpop.xlane.xlu0 %3099 }
0x185d   :  { %5365 = vrcp.f32 %v3100_v39  ;;  %v3097_v40 = vpop.xlane.xlu1 %3096 }
0x185e   :  { %5367 = vrcp.f32 %v3097_v40 }
0x1860   :  { %v5218_v41 = vpop.permute.xlu0 %5217 }
0x1861   :  { %v5220_v44 = vunpack.i.h.bf16 %v5218_v41  ;;  %v5219_v45 = vunpack.i.l.bf16 %v5218_v41  ;;  %v3193_v56 = vpop.permute.xlu1 %3192 }
0x1863   :  { %v4974_v15 = vpack.c.bf16 %v5220_v44, %v5219_v45 }
0x1864   :  { %v3195_v57 = vpop.permute.xlu0 %3194 }
0x1865   :  { %4975 = vmatprep.subr.bf16.mxu1 %v4974_v15  ;;  %v5233_v14 = vpop.permute.xlu1 %5232 }
0x1866   :  { %4977 = vmatpush3.bf16.msra.mxu1 %v4974_v15  ;;  %v5235_v24 = vunpack.i.h.bf16 %v5233_v14  ;;  %v5234_v25 = vunpack.i.l.bf16 %v5233_v14 }
0x1867   :  { %v5366_v51 = vpop.eup %5365  ;;  %4980 = vmatprep.subr.msk.bf16.mxu1 %vm5743_vm2, %v4978_v46 }
0x1868   :  { %v5368_v54 = vpop.eup %5367  ;;  %v3104_v27 = vmul.f32 %v5366_v51, %v5362_v49  ;;  %v4988_v10 = vpack.c.bf16 %v5235_v24, %v5234_v25 }
0x1869   :  { %v3102_v55 = vmul.f32 %v5368_v54, %v5364_v28 }
0x186b   :  { %4730 = vmatprep.mubr.msk.f32.mxu1 %vm302_vm3, %v3102_v55 }
0x186c   :  { %4731 = vmatmul.mubr.msk.f32.vlgmr.msra.gmra.mrb[30].mxu1 %vm302_vm3, %v3104_v27 }
0x186d   :  { %4737 = vmatprep.mubr.msk.f32.mxu1 %vm214_vm1, %v3193_v56 }
0x186f   :  { %4983 = vmatpush3.bf16.xpose.msk.msra.mxu1 %vm5743_vm2, %v4978_v46 }
0x1876   :  { %4738 = vmatmul.mubr.msk.f32.vlgmr.msra.gmra.mrb[32].mxu1 %vm214_vm1, %v3195_v57 }
0x193f   :  { %v6126_v60 = vpop.f32.mrb[30].mxu1 }
0x1940   :  { %v6128_v61 = vpop.f32.mrb[31].mxu1 }
0x1949   :  { %v4739_v62 = vpop.f32.mrb[32].mxu1 }
0x194a   :  { %v3280_v63 = vadd.f32 %v4739_v62, %v6004_v33  ;;  %v3274_v3 = vpop.f32.mrb[33].mxu1 }
0x194b   :  { %v3275_v6 = vadd.f32 %v3274_v3, %v6006_v34 }
0x194c   :  { %v3285_v9 = vmul.f32 1.442695, %v3280_v63 }
0x194d   :  { %v3283_v11 = vmul.f32 1.442695, %v3275_v6 }
0x194e   :  { %5369 = vpow2.f32 %v3285_v9 }
0x194f   :  { %5371 = vpow2.f32 %v3283_v11 }
0x1958   :  { %v5370_v8 = vpop.eup %5369 }
0x1959   :  { %v5372_v12 = vpop.eup %5371  ;;  %v3290_v17 = vsel %vm302_vm3, %v5370_v8, 0.0 }
0x195a   :  { %3291 = vadd.xlane.f32.xlu0 %v3290_v17  ;;  %v3287_v13 = vsel %vm302_vm3, %v5372_v12, 0.0 }
0x195b   :  { %3288 = vadd.xlane.f32.xlu1 %v3287_v13 }
0x196c   :  { %3384 = vrot.lane.b32.xlu1 %v5994_v31, %s5567_s29 }
0x1970   :  { %5227 = vrot.lane.b32.xlu0 %v6014_v29, %s5564_s25  ;;  %5242 = vrot.lane.b32.xlu1 %v5986_v21, %s5570_s8 }
0x1974   :  { %3386 = vrot.lane.b32.xlu0 %v5992_v30, %s5567_s29 }
0x19e7   :  { %v3292_v20 = vpop.xlane.xlu0 %3291 }
0x19e8   :  { %5373 = vrcp.f32 %v3292_v20  ;;  %v3289_v22 = vpop.xlane.xlu1 %3288 }
0x19e9   :  { %5375 = vrcp.f32 %v3289_v22 }
0x19eb   :  { %v5228_v23 = vpop.permute.xlu0 %5227 }
0x19ec   :  { %v5230_v35 = vunpack.i.h.bf16 %v5228_v23  ;;  %v5229_v36 = vunpack.i.l.bf16 %v5228_v23  ;;  %v3385_v5 = vpop.permute.xlu1 %3384 }
0x19ee   :  { %v4984_v0 = vpack.c.bf16 %v5230_v35, %v5229_v36 }
0x19ef   :  { %v3387_v48 = vpop.permute.xlu0 %3386 }
0x19f0   :  { %4985 = vmatprep.subr.bf16.mxu0 %v4984_v0  ;;  %v5243_v15 = vpop.permute.xlu1 %5242 }
0x19f1   :  { %4987 = vmatpush3.bf16.msra.mxu0 %v4984_v0  ;;  %v5245_v55 = vunpack.i.h.bf16 %v5243_v15  ;;  %v5244_v27 = vunpack.i.l.bf16 %v5243_v15 }
0x19f2   :  { %v5374_v18 = vpop.eup %5373  ;;  %4990 = vmatprep.subr.msk.bf16.mxu0 %vm5743_vm2, %v4988_v10 }
0x19f3   :  { %v5376_v21 = vpop.eup %5375  ;;  %v3296_v19 = vmul.f32 %v5374_v18, %v5370_v8  ;;  %v4998_v63 = vpack.c.bf16 %v5245_v55, %v5244_v27 }
0x19f4   :  { %v3294_v7 = vmul.f32 %v5376_v21, %v5372_v12 }
0x19f6   :  { %4744 = vmatprep.mubr.msk.f32.mxu0 %vm302_vm3, %v3294_v7 }
0x19f7   :  { %4745 = vmatmul.mubr.msk.f32.vlgmr.msra.gmra.mrb[30].mxu0 %vm302_vm3, %v3296_v19 }
0x19f8   :  { %4751 = vmatprep.mubr.msk.f32.mxu0 %vm214_vm1, %v3385_v5 }
0x19fa   :  { %4993 = vmatpush3.bf16.xpose.msk.msra.mxu0 %vm5743_vm2, %v4988_v10 }
0x1a01   :  { %4752 = vmatmul.mubr.msk.f32.vlgmr.msra.gmra.mrb[32].mxu0 %vm214_vm1, %v3387_v48 }
0x1aca   :  { %v6150_v49 = vpop.f32.mrb[30].mxu0 }
0x1acb   :  { %v6152_v28 = vpop.f32.mrb[31].mxu0 }
0x1ad4   :  { %v4753_v58 = vpop.f32.mrb[32].mxu0 }
0x1ad5   :  { %v3472_v59 = vadd.f32 %v4753_v58, %v6004_v33  ;;  %v3466_v38 = vpop.f32.mrb[33].mxu0 }
0x1ad6   :  { %v3467_v39 = vadd.f32 %v3466_v38, %v6006_v34 }
0x1ad7   :  { %v3477_v40 = vmul.f32 1.442695, %v3472_v59 }
0x1ad8   :  { %v3475_v41 = vmul.f32 1.442695, %v3467_v39 }
0x1ad9   :  { %5377 = vpow2.f32 %v3477_v40 }
0x1ada   :  { %5379 = vpow2.f32 %v3475_v41 }
0x1ae3   :  { %v5378_v42 = vpop.eup %5377 }
0x1ae4   :  { %v5380_v43 = vpop.eup %5379  ;;  %v3482_v44 = vsel %vm302_vm3, %v5378_v42, 0.0 }
0x1ae5   :  { %3483 = vadd.xlane.f32.xlu0 %v3482_v44  ;;  %v3479_v45 = vsel %vm302_vm3, %v5380_v43, 0.0 }
0x1ae6   :  { %3480 = vadd.xlane.f32.xlu1 %v3479_v45 }
0x1af7   :  { %3576 = vrot.lane.b32.xlu1 %v5994_v31, %s5570_s8 }
0x1afb   :  { %5237 = vrot.lane.b32.xlu0 %v6014_v29, %s5567_s29 }
0x1aff   :  { %3578 = vrot.lane.b32.xlu0 %v5992_v30, %s5570_s8 }
0x1b72   :  { %v3484_v46 = vpop.xlane.xlu0 %3483 }
0x1b73   :  { %5381 = vrcp.f32 %v3484_v46  ;;  %v3481_v51 = vpop.xlane.xlu1 %3480 }
0x1b74   :  { %5383 = vrcp.f32 %v3481_v51 }
0x1b76   :  { %v5238_v54 = vpop.permute.xlu0 %5237 }
0x1b77   :  { %v5240_v56 = vunpack.i.h.bf16 %v5238_v54  ;;  %v5239_v57 = vunpack.i.l.bf16 %v5238_v54  ;;  %v3577_v9 = vpop.permute.xlu1 %3576 }
0x1b79   :  { %v4994_v62 = vpack.c.bf16 %v5240_v56, %v5239_v57 }
0x1b7a   :  { %v3579_v11 = vpop.permute.xlu0 %3578 }
0x1b7b   :  { %4995 = vmatprep.subr.bf16.mxu1 %v4994_v62 }
0x1b7c   :  { %4997 = vmatpush3.bf16.msra.mxu1 %v4994_v62 }
0x1b7d   :  { %v5382_v31 = vpop.eup %5381  ;;  %5000 = vmatprep.subr.msk.bf16.mxu1 %vm5743_vm2, %v4998_v63 }
0x1b7e   :  { %v5384_v3 = vpop.eup %5383  ;;  %v3488_v6 = vmul.f32 %v5382_v31, %v5378_v42 }
0x1b7f   :  { %v3486_v30 = vmul.f32 %v5384_v3, %v5380_v43 }
0x1b81   :  { %4758 = vmatprep.mubr.msk.f32.mxu1 %vm302_vm3, %v3486_v30  ;;  %v4309_v30 = vld [vmem:[#allocation10 + $0x3] ss:$0 sm:$0xff] }
0x1b82   :  { %4759 = vmatmul.mubr.msk.f32.vlgmr.msra.gmra.mrb[34].mxu1 %vm302_vm3, %v3488_v6 }
0x1b83   :  { %4765 = vmatprep.mubr.msk.f32.mxu1 %vm214_vm1, %v3577_v9 }
0x1b85   :  { %5003 = vmatpush3.bf16.xpose.msk.msra.mxu1 %vm5743_vm2, %v4998_v63 }
0x1b8c   :  { %4766 = vmatmul.mubr.msk.f32.vlgmr.msra.gmra.mrb[36].mxu1 %vm214_vm1, %v3579_v11 }
0x1c55   :  { %v4760_v8 = vpop.f32.mrb[34].mxu1 }
0x1c56   :  { %v3567_v12 = vpop.f32.mrb[35].mxu1 }
0x1c5f   :  { %v4767_v17 = vpop.f32.mrb[36].mxu1 }
0x1c60   :  { %v3664_v13 = vadd.f32 %v4767_v17, %v6004_v33  ;;  %v3658_v14 = vpop.f32.mrb[37].mxu1 }
0x1c61   :  { %v3659_v20 = vadd.f32 %v3658_v14, %v6006_v34 }
0x1c62   :  { %v3669_v22 = vmul.f32 1.442695, %v3664_v13 }
0x1c63   :  { %v3667_v23 = vmul.f32 1.442695, %v3659_v20 }
0x1c64   :  { %5385 = vpow2.f32 %v3669_v22 }
0x1c65   :  { %5387 = vpow2.f32 %v3667_v23 }
0x1c6e   :  { %v5386_v24 = vpop.eup %5385 }
0x1c6f   :  { %v5388_v25 = vpop.eup %5387  ;;  %v3674_v16 = vsel %vm302_vm3, %v5386_v24, 0.0 }
0x1c70   :  { %3675 = vadd.xlane.f32.xlu0 %v3674_v16  ;;  %v3671_v35 = vsel %vm302_vm3, %v5388_v25, 0.0 }
0x1c71   :  { %3672 = vadd.xlane.f32.xlu1 %v3671_v35 }
0x1c82   :  { %5252 = vrot.lane.b32.xlu1 %v5960_v1, %s5546_s21 }
0x1c86   :  { %5247 = vrot.lane.b32.xlu0 %v6014_v29, %s5570_s8  ;;  %3770 = vrot.lane.b32.xlu1 %v6056_v32, %s5573_s13 }
0x1c8a   :  { %3772 = vrot.lane.b32.xlu0 %v6054_v26, %s5573_s13  ;;  %3778 = vrot.lane.b32.xlu1 %v6080_v53, %s5544_s10 }
0x1c8e   :  { %3780 = vrot.lane.b32.xlu0 %v6078_v52, %s5544_s10  ;;  %3786 = vrot.lane.b32.xlu1 %v6104_v4, %s5574_s3 }
0x1c92   :  { %5257 = vrot.lane.b32.xlu0 %v5966_v37, %s5546_s21  ;;  %3788 = vrot.lane.b32.xlu1 %v6102_v2, %s5574_s3  ;;  %s4186_s21 = sshll.u32 %s5579_s2, 4  ;;  %s4187_s21 = int_to_ptr.vmem [resolvable:$true] %s4186_s21 }
0x1c93   :  { %s5511_s5 = scalar_lea.vmem %s4187_s21, 256  ;;  %p5516_p13 = scmp.lt.s32.totalorder %s4187_s21, %s4187_s21 }
0x1c94   :  { %p5512_p12 = scmp.ne.s32.totalorder %s4187_s21, %s5511_s5  ;;  %p5517_p0 = scmp.lt.s32.totalorder %s5511_s5, %s5511_s5 }
0x1c96   :  { %3794 = vrot.lane.b32.xlu0 %v6128_v61, %s5575_s28  ;;  %3796 = vrot.lane.b32.xlu1 %v6126_v60, %s5575_s28  ;;  %p5518_p1 = por %p5517_p0, %p5516_p13 }
0x1c98   :  { %p5519_p2 = pnand %p5518_p1, %p5512_p12 }
0x1c9a   :  { %3802 = vrot.lane.b32.xlu0 %v6152_v28, %s5576_s24  ;;  %3804 = vrot.lane.b32.xlu1 %v6150_v49, %s5576_s24 }
0x1c9e   :  { %3810 = vrot.lane.b32.xlu0 %v3567_v12, %s5577_s15  ;;  %3812 = vrot.lane.b32.xlu1 %v4760_v8, %s5577_s15 }
0x1cfd   :  { %v3676_v1 = vpop.xlane.xlu0 %3675 }
0x1cfe   :  { %5389 = vrcp.f32 %v3676_v1  ;;  %v3673_v37 = vpop.xlane.xlu1 %3672 }
0x1cff   :  { %5391 = vrcp.f32 %v3673_v37  ;;  %v108_v37 = vld [vmem:[#allocation8 + $0x10] sm:$0xff] }
0x1d01   :  { %v5248_v33 = vpop.permute.xlu0 %5247 }
0x1d02   :  { %v5250_v34 = vunpack.i.h.bf16 %v5248_v33  ;;  %v5249_v29 = vunpack.i.l.bf16 %v5248_v33  ;;  %v5253_v26 = vpop.permute.xlu1 %5252  ;;  %v109_v33 = vld [vmem:[#allocation8 + $0x30] sm:$0xff] }
0x1d03   :  { %v5255_v32 = vunpack.i.h.bf16 %v5253_v26  ;;  %v5254_v52 = vunpack.i.l.bf16 %v5253_v26  ;;  %v111_v26 = vld [vmem:[#allocation8 + $0x70] sm:$0xff] }
0x1d04   :  { %v5004_v53 = vpack.c.bf16 %v5250_v34, %v5249_v29  ;;  %v5016_v34 = vpack.c.bf16 %v109_v33, %v108_v37  ;;  %v110_v29 = vld [vmem:[#allocation8 + $0x50] sm:$0xff]  ;;  %v4319_v33 = vld [vmem:[#allocation10 + $0x7] ss:$0 sm:$0xff] }
0x1d05   :  { %v5008_v2 = vpack.c.bf16 %v5255_v32, %v5254_v52  ;;  %v3773_v4 = vpop.permute.xlu0 %3772  ;;  %v5020_v32 = vpack.c.bf16 %v111_v26, %v110_v29  ;;  %v112_v52 = vld [vmem:[#allocation8 + $0x18] sm:$0xff] }
0x1d06   :  { %v3825_v60 = vsel %vm214_vm1, %v6030_v47, %v3773_v4  ;;  %5005 = vmatprep.subr.bf16.mxu0 %v5004_v53  ;;  %v3771_v28 = vpop.permute.xlu1 %3770  ;;  %5017 = vmatprep.subr.bf16.mxu1 %v5016_v34 }
0x1d07   :  { %5007 = vmatpush3.bf16.msra.mxu0 %v5004_v53  ;;  %v3824_v43 = vsel %vm214_vm1, %v6032_v50, %v3771_v28  ;;  %5019 = vmatpush3.bf16.msra.mxu1 %v5016_v34  ;;  %v113_v53 = vld [vmem:[#allocation8 + $0x38] sm:$0xff] }
0x1d08   :  { %v5390_v61 = vpop.eup %5389  ;;  %5009 = vmatprep.subr.bf16.mxu0 %v5008_v2  ;;  %5021 = vmatprep.subr.bf16.mxu1 %v5020_v32  ;;  %v5024_v4 = vpack.c.bf16 %v113_v53, %v112_v52 }
0x1d09   :  { %v5392_v36 = vpop.eup %5391  ;;  %v3781_v0 = vpop.permute.xlu0 %3780  ;;  %v3680_v21 = vmul.f32 %v5390_v61, %v5386_v24 }
0x1d0a   :  { %v3827_v10 = vsel %vm1802_vm4, %v3825_v60, %v3781_v0  ;;  %v3678_v18 = vmul.f32 %v5392_v36, %v5388_v25  ;;  %v3779_v58 = vpop.permute.xlu1 %3778  ;;  %v115_v60 = vld [vmem:[#allocation8 + $0x78] sm:$0xff] }
0x1d0b   :  { %v3826_v45 = vsel %vm1802_vm4, %v3824_v43, %v3779_v58  ;;  %5023 = vmatpush3.bf16.msra.mxu1 %v5020_v32 }
0x1d0c   :  { %4772 = vmatprep.mubr.msk.f32.mxu0 %vm302_vm3, %v3678_v18 }
0x1d0d   :  { %v5258_v7 = vpop.permute.xlu0 %5257  ;;  %4773 = vmatmul.mubr.msk.f32.vlgmr.msra.gmra.mrb[34].mxu0 %vm302_vm3, %v3680_v21 }
0x1d0e   :  { %v5260_v19 = vunpack.i.h.bf16 %v5258_v7  ;;  %v5259_v5 = vunpack.i.l.bf16 %v5258_v7  ;;  %5011 = vmatpush3.bf16.msra.mxu0 %v5008_v2  ;;  %v3787_v59 = vpop.permute.xlu1 %3786  ;;  %v114_v2 = vld [vmem:[#allocation8 + $0x58] sm:$0xff] }
0x1d0f   :  { %v3828_v46 = vsel %vm1805_vm5, %v3826_v45, %v3787_v59  ;;  %v5028_v61 = vpack.c.bf16 %v115_v60, %v114_v2 }
0x1d10   :  { %v5012_v48 = vpack.c.bf16 %v5260_v19, %v5259_v5  ;;  %v4312_v5 = vld [vmem:[#allocation10 + $0x4] ss:$0 sm:$0xff] }
0x1d11   :  { %v3795_v40 = vpop.permute.xlu0 %3794 }
0x1d12   :  { %5013 = vmatprep.subr.bf16.mxu0 %v5012_v48  ;;  %v3789_v38 = vpop.permute.xlu1 %3788  ;;  %v3830_v51 = vsel %vm302_vm3, %v3828_v46, %v3795_v40  ;;  %v4314_v40 = vld [vmem:[#allocation10 + $0x8] ss:$0 sm:$0xff]  ;;  %v4317_v46 = vld [vmem:[#allocation10 + $0x9] ss:$0 sm:$0xff] }
0x1d13   :  { %5015 = vmatpush3.bf16.msra.mxu0 %v5012_v48  ;;  %v3829_v54 = vsel %vm1805_vm5, %v3827_v10, %v3789_v38 }
0x1d14   :  { %5025 = vmatprep.subr.bf16.mxu0 %v5024_v4 }
0x1d15   :  { %v3803_v42 = vpop.permute.xlu0 %3802 }
0x1d16   :  { %v3797_v39 = vpop.permute.xlu1 %3796  ;;  %v3832_v55 = vsel %vm1810_vm6, %v3830_v51, %v3803_v42 }
0x1d17   :  { %v3831_v27 = vsel %vm302_vm3, %v3829_v54, %v3797_v39 }
0x1d19   :  { %v3811_v15 = vpop.permute.xlu0 %3810 }
0x1d1a   :  { %v3805_v41 = vpop.permute.xlu1 %3804  ;;  %v3834_v57 = vsel %vm1813_vm7, %v3832_v55, %v3811_v15 }
0x1d1b   :  { %v3833_v62 = vsel %vm1810_vm6, %v3831_v27, %v3805_v41 }
0x1d1e   :  { %v3813_v44 = vpop.permute.xlu1 %3812 }
0x1d1f   :  { %v3835_v63 = vsel %vm1813_vm7, %v3833_v62, %v3813_v44 }
0x1de0   :  { %v4774_v47 = vpop.f32.mrb[34].mxu0 }
0x1de1   :  { %3820 = vrot.lane.b32.xlu1 %v4774_v47, %s5578_s17  ;;  %v3759_v49 = vpop.f32.mrb[35].mxu0  ;;  %v4313_v47 = vld [vmem:[#allocation10 + $0x5] ss:$0 sm:$0xff] }
0x1de2   :  { %3818 = vrot.lane.b32.xlu0 %v3759_v49, %s5578_s17 }
0x1e53   :  { %v3821_v56 = vpop.permute.xlu1 %3820 }
0x1e54   :  { %v3819_v50 = vpop.permute.xlu0 %3818  ;;  %v3837_v3 = vsel %vm1816_vm8, %v3835_v63, %v3821_v56 }
0x1e55   :  { %v3836_v31 = vsel %vm1816_vm8, %v3834_v57, %v3819_v50 }
0x1e56   :  { %4783 = vmatprep.mubr.msk.f32.mxu0 %vm126_vm0, %v3836_v31 }
0x1e57   :  { %4784 = vmatmul.mubr.msk.f32.vlgmr.msra.gmra.mrb[36].mxu0 %vm126_vm0, %v3837_v3 }
0x1e58   :  { %5027 = vmatpush3.bf16.xpose.msra.mxu0 %v5024_v4 }
0x1e59   :  { %5029 = vmatprep.subr.bf16.mxu0 %v5028_v61 }
0x1e60   :  { %5031 = vmatpush3.bf16.xpose.msra.mxu0 %v5028_v61 }
0x1f2a   :  { %v4785_v6 = vpop.f32.mrb[36].mxu0 }
0x1f2b   :  { %v3932_v9 = vadd.f32 %v4785_v6, %v4309_v30  ;;  %v3926_v11 = vpop.f32.mrb[37].mxu0 }
0x1f2c   :  { %v3927_v8 = vadd.f32 %v4309_v30, %v3926_v11 }
0x1f2d   :  { %v3938_v12 = vsel %vm126_vm0, %v3932_v9, 0.0 }
0x1f2e   :  { %3939 = vadd.xlane.f32.xlu1 %v3938_v12  ;;  %v3935_v17 = vsel %vm126_vm0, %v3927_v8, 0.0 }
0x1f2f   :  { %3936 = vadd.xlane.f32.xlu0 %v3935_v17 }
0x1fbb   :  { %v3940_v13 = vpop.xlane.xlu1 %3939 }
0x1fbc   :  { %v3942_v14 = vmul.f32 0.03125, %v3940_v13  ;;  %v3937_v20 = vpop.xlane.xlu0 %3936 }
0x1fbd   :  { %v3941_v22 = vmul.f32 0.03125, %v3937_v20 }
0x1fbe   :  { %v3944_v23 = vsub.f32 %v3932_v9, %v3942_v14 }
0x1fbf   :  { %v3943_v24 = vsub.f32 %v3927_v8, %v3941_v22 }
0x1fc0   :  { %v3946_v35 = vmul.f32 %v3944_v23, %v3944_v23 }
0x1fc1   :  { %v3945_v25 = vmul.f32 %v3943_v24, %v3943_v24 }
0x1fc2   :  { %v3950_v1 = vsel %vm126_vm0, %v3946_v35, 0.0 }
0x1fc3   :  { %v3947_v16 = vsel %vm126_vm0, %v3945_v25, 0.0 }
0x1fc4   :  { %3948 = vadd.xlane.f32.xlu0 %v3947_v16  ;;  %v4318_v16 = vld [vmem:[#allocation10 + $0x6] ss:$0 sm:$0xff] }
0x1fc8   :  { %3951 = vadd.xlane.f32.xlu0 %v3950_v1 }
0x2051   :  { %v3949_v36 = vpop.xlane.xlu0 %3948 }
0x2052   :  { %v3953_v0 = vmul.f32 0.03125, %v3949_v36 }
0x2054   :  { %v3955_v10 = vadd.f32 1e-05, %v3953_v0 }
0x2055   :  { %v3952_v18 = vpop.xlane.xlu0 %3951 }
0x2056   :  { %5393 = vrsqrt.f32 %v3955_v10  ;;  %v3954_v21 = vmul.f32 0.03125, %v3952_v18 }
0x2058   :  { %v3956_v7 = vadd.f32 1e-05, %v3954_v21 }
0x205a   :  { %5395 = vrsqrt.f32 %v3956_v7 }
0x2060   :  { %v5394_v19 = vpop.eup %5393 }
0x2061   :  { %v3959_v48 = vmul.f32 %v5394_v19, %v3943_v24 }
0x2063   :  { %v3965_v49 = vmul.f32 %v4312_v5, %v3959_v48 }
0x2064   :  { %v5396_v28 = vpop.eup %5395 }
0x2065   :  { %v3960_v58 = vmul.f32 %v5396_v28, %v3944_v23  ;;  %v3971_v59 = vadd.f32 %v4313_v47, %v3965_v49 }
0x2067   :  { %v3966_v38 = vmul.f32 %v4312_v5, %v3960_v58  ;;  %4794 = vmatprep.mubr.msk.f32.mxu1 %vm126_vm0, %v3971_v59 }
0x2069   :  { %v3972_v39 = vadd.f32 %v4313_v47, %v3966_v38 }
0x206b   :  { %4795 = vmatmul.mubr.msk.f32.vlgmr.msra.gmra.mrb[38].mxu1 %vm126_vm0, %v3972_v39 }
0x213e   :  { %v4796_v41 = vpop.f32.mrb[38].mxu1 }
0x213f   :  { %v4055_v42 = vadd.f32 %v4796_v41, %v4314_v40  ;;  %v4049_v43 = vpop.f32.mrb[39].mxu1 }
0x2140   :  { %v4050_v44 = vadd.f32 %v4314_v40, %v4049_v43 }
0x2141   :  { %v4059_v15 = vmax.f32 %v4055_v42, 0.0 }
0x2142   :  { %v4058_v45 = vmax.f32 %v4050_v44, 0.0 }
0x2144   :  { %4805 = vmatprep.mubr.f32.mxu0 %v4058_v45 }
0x2145   :  { %4806 = vmatmul.mubr.f32.vlgmr.msra.gmra.mrb[38].mxu0 %v4059_v15 }
0x2218   :  { %v4807_v51 = vpop.f32.mrb[38].mxu0 }
0x2219   :  { %v4136_v54 = vadd.f32 %v4807_v51, %v4317_v46  ;;  %v4130_v55 = vpop.f32.mrb[39].mxu0 }
0x221a   :  { %v4131_v27 = vadd.f32 %v4317_v46, %v4130_v55 }
0x221b   :  { %v4140_v56 = vadd.f32 %v4136_v54, %v3972_v39 }
0x221c   :  { %v4139_v57 = vadd.f32 %v4131_v27, %v3971_v59 }
0x221d   :  { %v4144_v62 = vsel %vm126_vm0, %v4140_v56, 0.0 }
0x221e   :  { %4145 = vadd.xlane.f32.xlu0 %v4144_v62  ;;  %v4141_v50 = vsel %vm126_vm0, %v4139_v57, 0.0 }
0x221f   :  { %4142 = vadd.xlane.f32.xlu1 %v4141_v50 }
0x22ab   :  { %v4146_v63 = vpop.xlane.xlu0 %4145 }
0x22ac   :  { %v4148_v31 = vmul.f32 0.03125, %v4146_v63  ;;  %v4143_v3 = vpop.xlane.xlu1 %4142 }
0x22ad   :  { %v4147_v30 = vmul.f32 0.03125, %v4143_v3 }
0x22ae   :  { %v4150_v6 = vsub.f32 %v4140_v56, %v4148_v31 }
0x22af   :  { %v4149_v9 = vsub.f32 %v4139_v57, %v4147_v30 }
0x22b0   :  { %v4152_v11 = vmul.f32 %v4150_v6, %v4150_v6 }
0x22b1   :  { %v4151_v8 = vmul.f32 %v4149_v9, %v4149_v9 }
0x22b2   :  { %v4156_v12 = vsel %vm126_vm0, %v4152_v11, 0.0 }
0x22b3   :  { %4157 = vadd.xlane.f32.xlu0 %v4156_v12  ;;  %v4153_v17 = vsel %vm126_vm0, %v4151_v8, 0.0 }
0x22b4   :  { %4154 = vadd.xlane.f32.xlu1 %v4153_v17 }
0x2340   :  { %v4158_v13 = vpop.xlane.xlu0 %4157 }
0x2341   :  { %v4160_v14 = vmul.f32 0.03125, %v4158_v13  ;;  %v4155_v20 = vpop.xlane.xlu1 %4154 }
0x2342   :  { %v4159_v22 = vmul.f32 0.03125, %v4155_v20 }
0x2343   :  { %v4162_v23 = vadd.f32 1e-05, %v4160_v14 }
0x2344   :  { %v4161_v24 = vadd.f32 1e-05, %v4159_v22 }
0x2345   :  { %5397 = vrsqrt.f32 %v4162_v23 }
0x2346   :  { %5399 = vrsqrt.f32 %v4161_v24 }
0x234f   :  { %v5398_v25 = vpop.eup %5397 }
0x2350   :  { %v5400_v35 = vpop.eup %5399  ;;  %v4166_v1 = vmul.f32 %v5398_v25, %v4150_v6 }
0x2351   :  { %v4165_v37 = vmul.f32 %v5400_v35, %v4149_v9 }
0x2352   :  { %v4172_v34 = vmul.f32 %v4318_v16, %v4166_v1 }
0x2353   :  { %v4171_v29 = vmul.f32 %v4318_v16, %v4165_v37 }
0x2354   :  { %v4178_v26 = vadd.f32 %v4319_v33, %v4172_v34 }
0x2355   :  { %v4177_v32 = vadd.f32 %v4319_v33, %v4171_v29 }
0x2356   :  { %4180 = vst.msk [vmem:[#allocation11 + $0x8] sm:$0xff] %vm126_vm0, %v4178_v26 }
0x2357   :  { %4179 = vst.msk [vmem:[#allocation11] sm:$0xff] %vm126_vm0, %v4177_v32 }
0x2358   :  { %5522 = shalt.err (!%p5519_p2)
}
0x2359   :  { %s5523_s1 = scalar_lea.hbm %s6259_s6, 256 }
0x235a   :  { %p5524_p3 = scmp.ne.s32.totalorder %s6259_s6, %s5523_s1  ;;  %p5527_p4 = scmp.lt.u32.totalorder %s5523_s1, %s6259_s6 }
0x235c   :  { %p5529_p5 = pnand %p5527_p4, %p5524_p3 }
0x235e   :  { %5532 = shalt.err (!%p5529_p5)
}
0x235f   :  { %4192 = dma.vmem_to_hbm [thread:$0]  %s4187_s21, 256, %s6259_s6, [#allocation4], %s5543_s9, %s5543_s9, %s5544_s10  }
0x2360   :  { %5539 = dma.done.wait [#allocation4], 256  }
0x2361   :  { %5540 = vsyncadd [#allocation4], 4294967040 }
0x2362   :  { %4196 = vsyncpa [#allocation3], 1 }
0x2363   :  { %4197 = vsyncpa [#allocation6], 1 }
0x2364   :  { %4198 = vsyncpa [#allocation9], 1 }
0x2365   :  { %4199 = vsyncpa [#allocation4], 1 }

</bundles_post_ra>
